<compile_context>
chip_gen: v5e
topology: v5e:2x2
jax: 0.10.0
libtpu: 0.0.40
codegen_flags: <defaults>
</compile_context>

<pallas_src>
import jax
import jax.numpy as jnp
from jax.experimental import pallas as pl
from jax.experimental.pallas import tpu as pltpu

# ----------------------------- model dimensions -----------------------------
IN_CH, IMG_H, IMG_W = 4, 16, 16          # small synthetic image (NCHW)
IN_DIM = IN_CH * IMG_H * IMG_W           # 1024 flattened features
HIDDEN = 32                              # encoder / decoder hidden width
LATENT = 8                               # latent_dims
HID_PAD = 128                            # hidden width padded to full lanes
STATS_W = 128                            # packed [mu | logvar | z | 0] lanes
_Z0, _Z1 = 2 * LATENT, 3 * LATENT        # z occupies lanes [16, 24)


def _round_up(n, m):
    return ((n + m - 1) // m) * m


# ------------------------------- fused kernel --------------------------------
def vae_fused_kernel(x_ref, eps_ref,
                     ew1_ref, eb1_ref, wh_ref, bh_ref, wlz_ref, blz_ref,
                     dw1_ref, db1_ref, dw2_ref, db2_ref,
                     recon_ref, stats_ref):
    """Fused VAE forward for one batch tile (everything lane-dense, 128 wide).

    encoder : h = ReLU(x @ W1 + b1)                                (tb, 128)
    head    : base = h @ Wh + bh   -> lanes [mu | logvar | mu | 0] (tb, 128)
              lv_z = h @ Wlz + blz -> logvar only in z lanes       (tb, 128)
    reparam : stats = base + exp(0.5*lv_z) * eps                   (tb, 128)
              (eps is nonzero only in the z lanes, so the other lanes keep
               base: stats = [mu | logvar | z | 0] with no slicing/masking)
    decoder : hd = ReLU(stats @ Wd1 + bd1)  (Wd1 rows nonzero only at z lanes)
              recon = sigmoid(hd @ Wd2 + bd2)                      (tb, 1024)
    """
    # ----- encoder hidden layer (bf16 MXU, f32 accumulation)
    h = jnp.dot(x_ref[...], ew1_ref[...],
                preferred_element_type=jnp.float32) + eb1_ref[...]
    h = jnp.maximum(h, 0.0)                                   # nn.ReLU
    hb = h.astype(jnp.bfloat16)

    # ----- fused mu/logvar head (mu duplicated into the z lanes by the weights)
    base = jnp.dot(hb, wh_ref[...],
                   preferred_element_type=jnp.float32) + bh_ref[...]
    # logvar aligned to the z lanes, zero elsewhere (separate tiny MXU matmul)
    lv_z = jnp.dot(hb, wlz_ref[...],
                   preferred_element_type=jnp.float32) + blz_ref[...]

    # ----- reparameterization, fully lane-aligned (no slices, no concatenate):
    # non-z lanes: exp(0.5*0) * 0 = 0, so base ([mu|logvar|...|0]) is preserved;
    # z lanes:     mu + exp(0.5*logvar) * eps = z
    stats = base + jnp.exp(0.5 * lv_z) * eps_ref[...]
    stats_ref[...] = stats                                    # one unmasked store

    # ----- decoder (Wd1 has nonzero rows only at the z lanes -> uses only z)
    hd = jnp.dot(stats.astype(jnp.bfloat16), dw1_ref[...],
                 preferred_element_type=jnp.float32) + db1_ref[...]
    hd = jnp.maximum(hd, 0.0)                                 # nn.ReLU
    y = jnp.dot(hd.astype(jnp.bfloat16), dw2_ref[...],
                preferred_element_type=jnp.float32) + db2_ref[...]
    # exact sigmoid (EUP exp; hidden under the recon writeback DMA)
    recon_ref[...] = (1.0 / (1.0 + jnp.exp(-y))).astype(recon_ref.dtype)


# --------------------------------- wrapper -----------------------------------
def _vae_pallas(x_bf16, eps_full, kp, tb):
    pb = x_bf16.shape[0]
    grid = (pb // tb,)
    row = lambda i: (i, 0)        # batch-tiled arrays
    const = lambda i: (0, 0)      # weights: constant index_map -> VMEM-resident

    return pl.pallas_call(
        vae_fused_kernel,
        grid=grid,
        in_specs=[
            pl.BlockSpec((tb, IN_DIM), row),            # x (bf16)
            pl.BlockSpec((tb, STATS_W), row),           # eps (f32, z lanes only)
            pl.BlockSpec((IN_DIM, HID_PAD), const),     # enc_w1
            pl.BlockSpec((1, HID_PAD), const),          # enc_b1
            pl.BlockSpec((HID_PAD, STATS_W), const),    # w_head
            pl.BlockSpec((1, STATS_W), const),          # b_head
            pl.BlockSpec((HID_PAD, STATS_W), const),    # w_lvz
            pl.BlockSpec((1, STATS_W), const),          # b_lvz
            pl.BlockSpec((STATS_W, HID_PAD), const),    # dec_w1
            pl.BlockSpec((1, HID_PAD), const),          # dec_b1
            pl.BlockSpec((HID_PAD, IN_DIM), const),     # dec_w2
            pl.BlockSpec((1, IN_DIM), const),           # dec_b2
        ],
        out_specs=[
            pl.BlockSpec((tb, IN_DIM), row),            # recon (bf16, lane-dense)
            pl.BlockSpec((tb, STATS_W), row),           # packed stats (f32)
        ],
        out_shape=(
            jax.ShapeDtypeStruct((pb, IN_DIM), jnp.bfloat16),
            jax.ShapeDtypeStruct((pb, STATS_W), jnp.float32),
        ),
        compiler_params=pltpu.CompilerParams(
            dimension_semantics=("parallel",)),          # shard batch tiles (v7x)
    )(x_bf16, eps_full,
      kp["enc_w1"], kp["enc_b1"], kp["w_head"], kp["b_head"],
      kp["w_lvz"], kp["b_lvz"],
      kp["dec_w1"], kp["dec_b1"], kp["dec_w2"], kp["dec_b2"])


@jax.jit
def vae_forward(params, x, eps):
    """Equivalent of VariationalAutoencoder.forward:
       returns (decoder(z), mu, logvar, z).  `eps` is the reparameterization
       noise (shape (B, LATENT)); the original module draws it internally with
       torch.randn, here it is an explicit input for reproducibility."""
    B = x.shape[0]
    x_flat = x.reshape(B, IN_DIM).astype(jnp.bfloat16)

    # Batch tile: multiple of 16 rows (bf16 sublane packing), capped at 512,
    # and sized so the grid has >=2 steps for mid-size batches (both v7x TCs).
    tb = min(512, max(16, _round_up(-(-B // 2), 16)))
    pb = _round_up(B, tb)
    if pb != B:
        x_flat = jnp.pad(x_flat, ((0, pb - B), (0, 0)))

    # Place eps directly in the z lanes [16, 24) of a lane-dense (pb, 128) slab.
    eps_full = jnp.pad(eps.astype(jnp.float32),
                       ((0, pb - B), (_Z0, STATS_W - _Z1)))

    recon_p, stats_p = _vae_pallas(x_flat, eps_full, params, tb)

    mu = stats_p[:B, 0:LATENT]
    logvar = stats_p[:B, LATENT:2 * LATENT]
    z = stats_p[:B, _Z0:_Z1]
    recon = recon_p[:B].reshape(B, IN_CH, IMG_H, IMG_W)   # bf16 reconstruction
    return recon, mu, logvar, z


# --------------------------- deterministic init ------------------------------
def init_params(key):
    """Returns (kernel_params, logical_params).

    kernel_params hold the lane-padded / duplicated bf16 layouts consumed by
    the kernel; logical_params are the plain PyTorch-style matrices used by the
    pure-JAX reference check."""
    ks = jax.random.split(key, 10)
    wscale, bscale = 0.02, 0.01

    def rnd(k, shape, s):
        return s * jax.random.normal(k, shape, jnp.float32)

    logical = {
        "enc_w1": rnd(ks[0], (IN_DIM, HIDDEN), wscale),
        "enc_b1": rnd(ks[1], (HIDDEN,), bscale),
        "w_mu":   rnd(ks[2], (HIDDEN, LATENT), wscale),
        "b_mu":   rnd(ks[3], (LATENT,), bscale),
        "w_lv":   rnd(ks[4], (HIDDEN, LATENT), wscale),
        "b_lv":   rnd(ks[5], (LATENT,), bscale),
        "dec_w1": rnd(ks[6], (LATENT, HIDDEN), wscale),
        "dec_b1": rnd(ks[7], (HIDDEN,), bscale),
        "dec_w2": rnd(ks[8], (HIDDEN, IN_DIM), wscale),
        "dec_b2": rnd(ks[9], (IN_DIM,), bscale),
    }

    bf16 = jnp.bfloat16

    enc_w1 = jnp.zeros((IN_DIM, HID_PAD), jnp.float32).at[:, :HIDDEN].set(logical["enc_w1"])
    enc_b1 = jnp.zeros((1, HID_PAD), jnp.float32).at[0, :HIDDEN].set(logical["enc_b1"])

    # Head: lanes 0:8 = mu, 8:16 = logvar, 16:24 = mu (duplicated into z lanes).
    w_head = jnp.zeros((HID_PAD, STATS_W), jnp.float32)
    w_head = w_head.at[:HIDDEN, 0:LATENT].set(logical["w_mu"])
    w_head = w_head.at[:HIDDEN, LATENT:2 * LATENT].set(logical["w_lv"])
    w_head = w_head.at[:HIDDEN, _Z0:_Z1].set(logical["w_mu"])
    b_head = jnp.zeros((1, STATS_W), jnp.float32)
    b_head = b_head.at[0, 0:LATENT].set(logical["b_mu"])
    b_head = b_head.at[0, LATENT:2 * LATENT].set(logical["b_lv"])
    b_head = b_head.at[0, _Z0:_Z1].set(logical["b_mu"])

    # logvar head aligned to the z lanes (drives sigma = exp(0.5*logvar)).
    w_lvz = jnp.zeros((HID_PAD, STATS_W), jnp.float32).at[:HIDDEN, _Z0:_Z1].set(logical["w_lv"])
    b_lvz = jnp.zeros((1, STATS_W), jnp.float32).at[0, _Z0:_Z1].set(logical["b_lv"])

    # Decoder first layer reads only the z lanes of the packed stats.
    dec_w1 = jnp.zeros((STATS_W, HID_PAD), jnp.float32).at[_Z0:_Z1, :HIDDEN].set(logical["dec_w1"])
    dec_b1 = jnp.zeros((1, HID_PAD), jnp.float32).at[0, :HIDDEN].set(logical["dec_b1"])
    dec_w2 = jnp.zeros((HID_PAD, IN_DIM), jnp.float32).at[:HIDDEN, :].set(logical["dec_w2"])
    dec_b2 = logical["dec_b2"].reshape(1, IN_DIM)

    kernel_params = {
        "enc_w1": enc_w1.astype(bf16), "enc_b1": enc_b1,
        "w_head": w_head.astype(bf16), "b_head": b_head,
        "w_lvz":  w_lvz.astype(bf16),  "b_lvz":  b_lvz,
        "dec_w1": dec_w1.astype(bf16), "dec_b1": dec_b1,
        "dec_w2": dec_w2.astype(bf16), "dec_b2": dec_b2,
    }
    return kernel_params, logical


# ------------------------- pure-JAX reference (check) -------------------------
def _ref_forward(logical, x, eps):
    """Full VAE forward mirroring the kernel's bf16-weight / f32-accum strategy."""
    B = x.shape[0]
    bf = lambda a: a.astype(jnp.bfloat16)
    xb = bf(x.reshape(B, IN_DIM))
    h = jnp.maximum(jnp.dot(xb, bf(logical["enc_w1"]),
                            preferred_element_type=jnp.float32)
                    + logical["enc_b1"], 0.0)
    hb = bf(h)
    mu = jnp.dot(hb, bf(logical["w_mu"]),
                 preferred_element_type=jnp.float32) + logical["b_mu"]
    lv = jnp.dot(hb, bf(logical["w_lv"]),
                 preferred_element_type=jnp.float32) + logical["b_lv"]
    z = mu + jnp.exp(0.5 * lv) * eps
    hd = jnp.maximum(jnp.dot(bf(z), bf(logical["dec_w1"]),
                             preferred_element_type=jnp.float32)
                     + logical["dec_b1"], 0.0)
    y = jnp.dot(bf(hd), bf(logical["dec_w2"]),
                preferred_element_type=jnp.float32) + logical["dec_b2"]
    recon = 1.0 / (1.0 + jnp.exp(-y))
    return recon.reshape(B, IN_CH, IMG_H, IMG_W), mu, lv, z


if __name__ == "__main__":
    key = jax.random.PRNGKey(0)
    k_param, k_x, k_eps = jax.random.split(key, 3)

    kernel_params, logical_params = init_params(k_param)
    x = jax.random.normal(k_x, (2, IN_CH, IMG_H, IMG_W), jnp.float32)   # NCHW
    eps = jax.random.normal(k_eps, (2, LATENT), jnp.float32)            # reparam noise

    recon, mu, logvar, z = vae_forward(kernel_params, x, eps)
    jax.block_until_ready((recon, mu, logvar, z))

    # shape contract of VariationalAutoencoder.forward
    assert recon.shape == x.shape
    assert mu.shape == (2, LATENT) and logvar.shape == (2, LATENT)
    assert z.shape == (2, LATENT)

    # numerical check against a pure-JAX reference (same eps, same bf16 policy)
    r_ref, mu_ref, lv_ref, z_ref = _ref_forward(logical_params, x, eps)
    assert bool(jnp.allclose(mu, mu_ref, atol=1e-2, rtol=1e-2))
    assert bool(jnp.allclose(logvar, lv_ref, atol=1e-2, rtol=1e-2))
    assert bool(jnp.allclose(z, z_ref, atol=1e-2, rtol=1e-2))
    assert bool(jnp.allclose(recon.astype(jnp.float32), r_ref, atol=2e-2, rtol=2e-2))
    # exact sigmoid -> reconstruction stays inside [0, 1] and finite
    assert bool(jnp.all(jnp.isfinite(recon.astype(jnp.float32))))
    assert bool(jnp.all((recon >= 0.0) & (recon <= 1.0)))

    print("KERNEL_OK")
</pallas_src>

<mosaic_0001>
module attributes {stable_mosaic.version = 11 : i64} {
  func.func @vae_fused_kernel(%arg0: i32, %arg1: memref<16x1024xbf16, #tpu.memory_space<vmem>>, %arg2: memref<16x128xf32, #tpu.memory_space<vmem>>, %arg3: memref<1024x128xbf16, #tpu.memory_space<vmem>>, %arg4: memref<1x128xf32, #tpu.memory_space<vmem>>, %arg5: memref<128x128xbf16, #tpu.memory_space<vmem>>, %arg6: memref<1x128xf32, #tpu.memory_space<vmem>>, %arg7: memref<128x128xbf16, #tpu.memory_space<vmem>>, %arg8: memref<1x128xf32, #tpu.memory_space<vmem>>, %arg9: memref<128x128xbf16, #tpu.memory_space<vmem>>, %arg10: memref<1x128xf32, #tpu.memory_space<vmem>>, %arg11: memref<128x1024xbf16, #tpu.memory_space<vmem>>, %arg12: memref<1x1024xf32, #tpu.memory_space<vmem>>, %arg13: memref<16x1024xbf16, #tpu.memory_space<vmem>>, %arg14: memref<16x128xf32, #tpu.memory_space<vmem>>) attributes {dimension_semantics = [#tpu.dimension_semantics<parallel>], iteration_bounds = array<i64: 1>, scalar_prefetch = 0 : i64, scratch_operands = 0 : i64, tpu.core_type = #tpu.core_type<tc>, window_params = [{transform_indices = @transform_0, window_bounds = array<i64: 16, 1024>}, {transform_indices = @transform_1, window_bounds = array<i64: 16, 128>}, {pipeline_mode = #tpu.pipeline_mode<synchronous>, transform_indices = @transform_2, window_bounds = array<i64: 1024, 128>}, {pipeline_mode = #tpu.pipeline_mode<synchronous>, transform_indices = @transform_3, window_bounds = array<i64: 1, 128>}, {pipeline_mode = #tpu.pipeline_mode<synchronous>, transform_indices = @transform_4, window_bounds = array<i64: 128, 128>}, {pipeline_mode = #tpu.pipeline_mode<synchronous>, transform_indices = @transform_5, window_bounds = array<i64: 1, 128>}, {pipeline_mode = #tpu.pipeline_mode<synchronous>, transform_indices = @transform_6, window_bounds = array<i64: 128, 128>}, {pipeline_mode = #tpu.pipeline_mode<synchronous>, transform_indices = @transform_7, window_bounds = array<i64: 1, 128>}, {pipeline_mode = #tpu.pipeline_mode<synchronous>, transform_indices = @transform_8, window_bounds = array<i64: 128, 128>}, {pipeline_mode = #tpu.pipeline_mode<synchronous>, transform_indices = @transform_9, window_bounds = array<i64: 1, 128>}, {pipeline_mode = #tpu.pipeline_mode<synchronous>, transform_indices = @transform_10, window_bounds = array<i64: 128, 1024>}, {pipeline_mode = #tpu.pipeline_mode<synchronous>, transform_indices = @transform_11, window_bounds = array<i64: 1, 1024>}, {transform_indices = @transform_12, window_bounds = array<i64: 16, 1024>}, {transform_indices = @transform_13, window_bounds = array<i64: 16, 128>}]} {
    %c0 = arith.constant 0 : index
    %c0_0 = arith.constant 0 : index
    %0 = vector.load %arg1[%c0, %c0_0] : memref<16x1024xbf16, #tpu.memory_space<vmem>>, vector<16x1024xbf16>
    %c0_1 = arith.constant 0 : index
    %c0_2 = arith.constant 0 : index
    %1 = vector.load %arg3[%c0_1, %c0_2] : memref<1024x128xbf16, #tpu.memory_space<vmem>>, vector<1024x128xbf16>
    %cst = arith.constant dense<0.000000e+00> : vector<16x128xf32>
    %2 = tpu.matmul %0, %1, %cst {dimension_numbers = #tpu.dot_dimension_numbers<[1], [0], [0], [1], [0, 0, 1, 1], [], []>} : vector<16x1024xbf16>, vector<1024x128xbf16>, vector<16x128xf32> -> vector<16x128xf32>
    %c0_3 = arith.constant 0 : index
    %c0_4 = arith.constant 0 : index
    %3 = vector.load %arg4[%c0_3, %c0_4] : memref<1x128xf32, #tpu.memory_space<vmem>>, vector<1x128xf32>
    %4 = vector.broadcast %3 : vector<1x128xf32> to vector<16x128xf32>
    %5 = arith.addf %2, %4 : vector<16x128xf32>
    %cst_5 = arith.constant 0.000000e+00 : f32
    %6 = vector.broadcast %cst_5 : f32 to vector<16x128xf32>
    %7 = arith.maximumf %5, %6 : vector<16x128xf32>
    %8 = arith.truncf %7 : vector<16x128xf32> to vector<16x128xbf16>
    %c0_6 = arith.constant 0 : index
    %c0_7 = arith.constant 0 : index
    %9 = vector.load %arg5[%c0_6, %c0_7] : memref<128x128xbf16, #tpu.memory_space<vmem>>, vector<128x128xbf16>
    %cst_8 = arith.constant dense<0.000000e+00> : vector<16x128xf32>
    %10 = tpu.matmul %8, %9, %cst_8 {dimension_numbers = #tpu.dot_dimension_numbers<[1], [0], [0], [1], [0, 0, 1, 1], [], []>} : vector<16x128xbf16>, vector<128x128xbf16>, vector<16x128xf32> -> vector<16x128xf32>
    %c0_9 = arith.constant 0 : index
    %c0_10 = arith.constant 0 : index
    %11 = vector.load %arg6[%c0_9, %c0_10] : memref<1x128xf32, #tpu.memory_space<vmem>>, vector<1x128xf32>
    %12 = vector.broadcast %11 : vector<1x128xf32> to vector<16x128xf32>
    %13 = arith.addf %10, %12 : vector<16x128xf32>
    %c0_11 = arith.constant 0 : index
    %c0_12 = arith.constant 0 : index
    %14 = vector.load %arg7[%c0_11, %c0_12] : memref<128x128xbf16, #tpu.memory_space<vmem>>, vector<128x128xbf16>
    %cst_13 = arith.constant dense<0.000000e+00> : vector<16x128xf32>
    %15 = tpu.matmul %8, %14, %cst_13 {dimension_numbers = #tpu.dot_dimension_numbers<[1], [0], [0], [1], [0, 0, 1, 1], [], []>} : vector<16x128xbf16>, vector<128x128xbf16>, vector<16x128xf32> -> vector<16x128xf32>
    %c0_14 = arith.constant 0 : index
    %c0_15 = arith.constant 0 : index
    %16 = vector.load %arg8[%c0_14, %c0_15] : memref<1x128xf32, #tpu.memory_space<vmem>>, vector<1x128xf32>
    %17 = vector.broadcast %16 : vector<1x128xf32> to vector<16x128xf32>
    %18 = arith.addf %15, %17 : vector<16x128xf32>
    %cst_16 = arith.constant 5.000000e-01 : f32
    %19 = vector.broadcast %cst_16 : f32 to vector<16x128xf32>
    %20 = arith.mulf %19, %18 : vector<16x128xf32>
    %21 = math.exp %20 : vector<16x128xf32>
    %c0_17 = arith.constant 0 : index
    %c0_18 = arith.constant 0 : index
    %22 = vector.load %arg2[%c0_17, %c0_18] : memref<16x128xf32, #tpu.memory_space<vmem>>, vector<16x128xf32>
    %23 = arith.mulf %21, %22 : vector<16x128xf32>
    %24 = arith.addf %13, %23 : vector<16x128xf32>
    %c0_19 = arith.constant 0 : index
    %c0_20 = arith.constant 0 : index
    %25 = vector.load %arg14[%c0_19, %c0_20] : memref<16x128xf32, #tpu.memory_space<vmem>>, vector<16x128xf32>
    tpu.vector_store %arg14[%c0_19, %c0_20], %24 {strides = array<i32>} : memref<16x128xf32, #tpu.memory_space<vmem>>, vector<16x128xf32>,
    %26 = arith.truncf %24 : vector<16x128xf32> to vector<16x128xbf16>
    %c0_21 = arith.constant 0 : index
    %c0_22 = arith.constant 0 : index
    %27 = vector.load %arg9[%c0_21, %c0_22] : memref<128x128xbf16, #tpu.memory_space<vmem>>, vector<128x128xbf16>
    %cst_23 = arith.constant dense<0.000000e+00> : vector<16x128xf32>
    %28 = tpu.matmul %26, %27, %cst_23 {dimension_numbers = #tpu.dot_dimension_numbers<[1], [0], [0], [1], [0, 0, 1, 1], [], []>} : vector<16x128xbf16>, vector<128x128xbf16>, vector<16x128xf32> -> vector<16x128xf32>
    %c0_24 = arith.constant 0 : index
    %c0_25 = arith.constant 0 : index
    %29 = vector.load %arg10[%c0_24, %c0_25] : memref<1x128xf32, #tpu.memory_space<vmem>>, vector<1x128xf32>
    %30 = vector.broadcast %29 : vector<1x128xf32> to vector<16x128xf32>
    %31 = arith.addf %28, %30 : vector<16x128xf32>
    %cst_26 = arith.constant 0.000000e+00 : f32
    %32 = vector.broadcast %cst_26 : f32 to vector<16x128xf32>
    %33 = arith.maximumf %31, %32 : vector<16x128xf32>
    %34 = arith.truncf %33 : vector<16x128xf32> to vector<16x128xbf16>
    %c0_27 = arith.constant 0 : index
    %c0_28 = arith.constant 0 : index
    %35 = vector.load %arg11[%c0_27, %c0_28] : memref<128x1024xbf16, #tpu.memory_space<vmem>>, vector<128x1024xbf16>
    %cst_29 = arith.constant dense<0.000000e+00> : vector<16x1024xf32>
    %36 = tpu.matmul %34, %35, %cst_29 {dimension_numbers = #tpu.dot_dimension_numbers<[1], [0], [0], [1], [0, 0, 1, 1], [], []>} : vector<16x128xbf16>, vector<128x1024xbf16>, vector<16x1024xf32> -> vector<16x1024xf32>
    %c0_30 = arith.constant 0 : index
    %c0_31 = arith.constant 0 : index
    %37 = vector.load %arg12[%c0_30, %c0_31] : memref<1x1024xf32, #tpu.memory_space<vmem>>, vector<1x1024xf32>
    %38 = vector.broadcast %37 : vector<1x1024xf32> to vector<16x1024xf32>
    %39 = arith.addf %36, %38 : vector<16x1024xf32>
    %cst_32 = arith.constant 0.000000e+00 : f32
    %40 = vector.broadcast %cst_32 : f32 to vector<16x1024xf32>
    %41 = arith.subf %40, %39 : vector<16x1024xf32>
    %42 = math.exp %41 : vector<16x1024xf32>
    %cst_33 = arith.constant 1.000000e+00 : f32
    %43 = vector.broadcast %cst_33 : f32 to vector<16x1024xf32>
    %44 = arith.addf %43, %42 : vector<16x1024xf32>
    %cst_34 = arith.constant 1.000000e+00 : f32
    %45 = vector.broadcast %cst_34 : f32 to vector<16x1024xf32>
    %46 = arith.divf %45, %44 : vector<16x1024xf32>
    %47 = arith.truncf %46 : vector<16x1024xf32> to vector<16x1024xbf16>
    %c0_35 = arith.constant 0 : index
    %c0_36 = arith.constant 0 : index
    %48 = vector.load %arg13[%c0_35, %c0_36] : memref<16x1024xbf16, #tpu.memory_space<vmem>>, vector<16x1024xbf16>
    tpu.vector_store %arg13[%c0_35, %c0_36], %47 {strides = array<i32>} : memref<16x1024xbf16, #tpu.memory_space<vmem>>, vector<16x1024xbf16>,
    return
  }
  func.func @transform_0(%arg0: i32) -> (i32, i32) {
    %c0_i32 = arith.constant 0 : i32
    %c0_i32_0 = arith.constant 0 : i32
    return %arg0, %c0_i32 : i32, i32
  }
  func.func @transform_1(%arg0: i32) -> (i32, i32) {
    %c0_i32 = arith.constant 0 : i32
    %c0_i32_0 = arith.constant 0 : i32
    return %arg0, %c0_i32 : i32, i32
  }
  func.func @transform_2(%arg0: i32) -> (i32, i32) {
    %c0_i32 = arith.constant 0 : i32
    %c0_i32_0 = arith.constant 0 : i32
    %c0_i32_1 = arith.constant 0 : i32
    return %c0_i32, %c0_i32_0 : i32, i32
  }
  func.func @transform_3(%arg0: i32) -> (i32, i32) {
    %c0_i32 = arith.constant 0 : i32
    %c0_i32_0 = arith.constant 0 : i32
    %c0_i32_1 = arith.constant 0 : i32
    return %c0_i32, %c0_i32_0 : i32, i32
  }
  func.func @transform_4(%arg0: i32) -> (i32, i32) {
    %c0_i32 = arith.constant 0 : i32
    %c0_i32_0 = arith.constant 0 : i32
    %c0_i32_1 = arith.constant 0 : i32
    return %c0_i32, %c0_i32_0 : i32, i32
  }
  func.func @transform_5(%arg0: i32) -> (i32, i32) {
    %c0_i32 = arith.constant 0 : i32
    %c0_i32_0 = arith.constant 0 : i32
    %c0_i32_1 = arith.constant 0 : i32
    return %c0_i32, %c0_i32_0 : i32, i32
  }
  func.func @transform_6(%arg0: i32) -> (i32, i32) {
    %c0_i32 = arith.constant 0 : i32
    %c0_i32_0 = arith.constant 0 : i32
    %c0_i32_1 = arith.constant 0 : i32
    return %c0_i32, %c0_i32_0 : i32, i32
  }
  func.func @transform_7(%arg0: i32) -> (i32, i32) {
    %c0_i32 = arith.constant 0 : i32
    %c0_i32_0 = arith.constant 0 : i32
    %c0_i32_1 = arith.constant 0 : i32
    return %c0_i32, %c0_i32_0 : i32, i32
  }
  func.func @transform_8(%arg0: i32) -> (i32, i32) {
    %c0_i32 = arith.constant 0 : i32
    %c0_i32_0 = arith.constant 0 : i32
    %c0_i32_1 = arith.constant 0 : i32
    return %c0_i32, %c0_i32_0 : i32, i32
  }
  func.func @transform_9(%arg0: i32) -> (i32, i32) {
    %c0_i32 = arith.constant 0 : i32
    %c0_i32_0 = arith.constant 0 : i32
    %c0_i32_1 = arith.constant 0 : i32
    return %c0_i32, %c0_i32_0 : i32, i32
  }
  func.func @transform_10(%arg0: i32) -> (i32, i32) {
    %c0_i32 = arith.constant 0 : i32
    %c0_i32_0 = arith.constant 0 : i32
    %c0_i32_1 = arith.constant 0 : i32
    return %c0_i32, %c0_i32_0 : i32, i32
  }
  func.func @transform_11(%arg0: i32) -> (i32, i32) {
    %c0_i32 = arith.constant 0 : i32
    %c0_i32_0 = arith.constant 0 : i32
    %c0_i32_1 = arith.constant 0 : i32
    return %c0_i32, %c0_i32_0 : i32, i32
  }
  func.func @transform_12(%arg0: i32) -> (i32, i32) {
    %c0_i32 = arith.constant 0 : i32
    %c0_i32_0 = arith.constant 0 : i32
    return %arg0, %c0_i32 : i32, i32
  }
  func.func @transform_13(%arg0: i32) -> (i32, i32) {
    %c0_i32 = arith.constant 0 : i32
    %c0_i32_0 = arith.constant 0 : i32
    return %arg0, %c0_i32 : i32, i32
  }
}

</mosaic_0001>

<bundles_post_ra>
// kernel: vae_forward.1
= control target key start
LH: loop header
LB: loop body
LE: loop exit
PB: predicated region body
PF: predicated region fallthrough
CT: control target
= control target key end

     0   :  { %19 = vsyncpa [#allocation3], 0  ;;  %s3348_s0 = inlined_call_operand.vmem [shape: bf16[16,1024], index: 0, kind: input, shape index: {}]   ;;  %s3349_s1 = inlined_call_operand.vmem [shape: f32[16,128], index: 1, kind: input, shape index: {}]   ;;  %s3350_s2 = inlined_call_operand.hbm [shape: bf16[1024,128], index: 2, kind: input, shape index: {}]   ;;  %s3351_s3 = inlined_call_operand.vmem [shape: f32[1,128], index: 3, kind: input, shape index: {}]   ;;  %s3352_s4 = inlined_call_operand.vmem [shape: bf16[128,128], index: 4, kind: input, shape index: {}]   ;;  %s3353_s5 = inlined_call_operand.vmem [shape: f32[1,128], index: 5, kind: input, shape index: {}]   ;;  %s3354_s6 = inlined_call_operand.vmem [shape: bf16[128,128], index: 6, kind: input, shape index: {}]   ;;  %s3355_s7 = inlined_call_operand.vmem [shape: f32[1,128], index: 7, kind: input, shape index: {}]   ;;  %s3356_s8 = inlined_call_operand.vmem [shape: bf16[128,128], index: 8, kind: input, shape index: {}]   ;;  %s3357_s9 = inlined_call_operand.vmem [shape: f32[1,128], index: 9, kind: input, shape index: {}]   ;;  %s3358_s10 = inlined_call_operand.hbm [shape: bf16[128,1024], index: 10, kind: input, shape index: {}]   ;;  %s3359_s11 = inlined_call_operand.vmem [shape: f32[1,1024], index: 11, kind: input, shape index: {}]   ;;  %s3360_s12 = inlined_call_operand.vmem [shape: bf16[16,1024], index: 12, kind: output, shape index: {0}]   ;;  %s3361_s13 = inlined_call_operand.vmem [shape: f32[16,128], index: 13, kind: output, shape index: {1}]  }
   0x1   :  { %s29_s27 = sshll.u32 %s3350_s2, 4  ;;  %s30_s27 = int_to_ptr.hbm [resolvable:$true] %s29_s27 }
   0x2   :  { %20 = vsyncpa [#allocation5], 0  ;;  %s2792_s28 = smov [#allocation2]   ;;  %s56_s15 = sshll.u32 %s3358_s10, 4  ;;  %s57_s15 = int_to_ptr.hbm [resolvable:$true] %s56_s15 }
   0x3   :  { %s31_s29 = sshll.u32 %s2792_s28, 4  ;;  %s2793_s16 = smov 64   ;;  %s32_s29 = int_to_ptr.vmem [resolvable:$true] %s31_s29 }
   0x4   :  { %s2794_s17 = smov 4   ;;  %s2795_s18 = smov [#allocation4]  }
   0x5   :  { %37 = dma.hbm_to_vmem [thread:$0]  %s30_s27, 8192, %s32_s29, [#allocation3], %s2793_s16, %s2793_s16, %s2794_s17  }
   0x6   :  { %s58_s19 = sshll.u32 %s2795_s18, 4  ;;  %s2796_s20 = smov 512   ;;  %s59_s19 = int_to_ptr.vmem [resolvable:$true] %s58_s19 }
   0x7   :  { %s2797_s21 = smov 32  }
   0x8   :  { %64 = dma.hbm_to_vmem [thread:$0]  %s57_s15, 8192, %s59_s19, [#allocation5], %s2796_s20, %s2796_s20, %s2797_s21  }
   0x9   :  { %2788 = dma.done.wait [#allocation3], 8192  }
   0xa   :  { %2789 = vsyncadd [#allocation3], 4294959104 }
   0xb   :  { %2790 = dma.done.wait [#allocation5], 8192  }
   0xc   :  { %2791 = vsyncadd [#allocation5], 4294959104  ;;  %v2517_v0 = vld [vmem:[#allocation2 + $0x38] sm:$0xff]  ;;  %v2516_v4 = vld [vmem:[#allocation2 + $0x30] sm:$0xff] }
   0xd   :  { %v2525_v1 = vld [vmem:[#allocation2 + $0x78] sm:$0xff]  ;;  %639 = vmatpush.bf16.msra.mxu0 %v2517_v0  ;;  %v2524_v5 = vld [vmem:[#allocation2 + $0x70] sm:$0xff]  ;;  %v2515_v8 = vld [vmem:[#allocation2 + $0x28] sm:$0xff] }
   0xe   :  { %v2533_v2 = vld [vmem:[#allocation2 + $0xb8] sm:$0xff]  ;;  %653 = vmatpush.bf16.msra.mxu1 %v2525_v1  ;;  %v2532_v6 = vld [vmem:[#allocation2 + $0xb0] sm:$0xff]  ;;  %v2523_v9 = vld [vmem:[#allocation2 + $0x68] sm:$0xff] }
   0xf   :  { %v2541_v3 = vld [vmem:[#allocation2 + $0xf8] sm:$0xff]  ;;  %667 = vmatpush.bf16.msra.mxu2 %v2533_v2  ;;  %v2540_v7 = vld [vmem:[#allocation2 + $0xf0] sm:$0xff]  ;;  %v2531_v10 = vld [vmem:[#allocation2 + $0xa8] sm:$0xff] }
  0x10   :  { %681 = vmatpush.bf16.msra.mxu3 %v2541_v3  ;;  %v2539_v11 = vld [vmem:[#allocation2 + $0xe8] sm:$0xff]  ;;  %v2514_v12 = vld [vmem:[#allocation2 + $0x20] sm:$0xff]  ;;  %v2513_v16 = vld [vmem:[#allocation2 + $0x18] sm:$0xff] }
  0x11   :  { %640 = vmatpush.bf16.msra.mxu0 %v2516_v4  ;;  %v2522_v13 = vld [vmem:[#allocation2 + $0x60] sm:$0xff]  ;;  %v2521_v17 = vld [vmem:[#allocation2 + $0x58] sm:$0xff]  ;;  %v2512_v20 = vld [vmem:[#allocation2 + $0x10] sm:$0xff] }
  0x12   :  { %654 = vmatpush.bf16.msra.mxu1 %v2524_v5  ;;  %v2530_v14 = vld [vmem:[#allocation2 + $0xa0] sm:$0xff]  ;;  %v2529_v18 = vld [vmem:[#allocation2 + $0x98] sm:$0xff]  ;;  %v2520_v21 = vld [vmem:[#allocation2 + $0x50] sm:$0xff] }
  0x13   :  { %668 = vmatpush.bf16.msra.mxu2 %v2532_v6  ;;  %v2538_v15 = vld [vmem:[#allocation2 + $0xe0] sm:$0xff]  ;;  %v2537_v19 = vld [vmem:[#allocation2 + $0xd8] sm:$0xff]  ;;  %v2528_v22 = vld [vmem:[#allocation2 + $0x90] sm:$0xff] }
  0x14   :  { %682 = vmatpush.bf16.msra.mxu3 %v2540_v7  ;;  %v2536_v23 = vld [vmem:[#allocation2 + $0xd0] sm:$0xff]  ;;  %v2511_v24 = vld [vmem:[#allocation2 + $0x8] sm:$0xff]  ;;  %v2510_v28 = vld [vmem:[#allocation2] sm:$0xff] }
  0x15   :  { %641 = vmatpush.bf16.msra.mxu0 %v2515_v8  ;;  %v2519_v25 = vld [vmem:[#allocation2 + $0x48] sm:$0xff]  ;;  %v2518_v29 = vld [vmem:[#allocation2 + $0x40] sm:$0xff]  ;;  %v2549_v32 = vld [vmem:[#allocation2 + $0x138] sm:$0xff] }
  0x16   :  { %655 = vmatpush.bf16.msra.mxu1 %v2523_v9  ;;  %v2527_v26 = vld [vmem:[#allocation2 + $0x88] sm:$0xff]  ;;  %v2526_v30 = vld [vmem:[#allocation2 + $0x80] sm:$0xff]  ;;  %v2557_v33 = vld [vmem:[#allocation2 + $0x178] sm:$0xff] }
  0x17   :  { %669 = vmatpush.bf16.msra.mxu2 %v2531_v10  ;;  %v2535_v27 = vld [vmem:[#allocation2 + $0xc8] sm:$0xff]  ;;  %v2534_v31 = vld [vmem:[#allocation2 + $0xc0] sm:$0xff]  ;;  %v2565_v42 = vld [vmem:[#allocation2 + $0x1b8] sm:$0xff] }
  0x18   :  { %683 = vmatpush.bf16.msra.mxu3 %v2539_v11  ;;  %v1872_v34 = vld [vmem:[%s3348_s0 + $0x8] sm:$0xf]  ;;  %v1864_v36 = vld [vmem:[%s3348_s0] sm:$0xf]  ;;  %v2503_v38 = vld [vmem:[%s3348_s0 + $0xc] sm:$0xf] }
  0x19   :  { %642 = vmatpush.bf16.msra.mxu0 %v2514_v12  ;;  %v2507_v35 = vld [vmem:[%s3348_s0 + $0x24] sm:$0xf0]  ;;  %v2506_v37 = vld [vmem:[%s3348_s0 + $0x1c] sm:$0xf0]  ;;  %v1874_v39 = vld [vmem:[%s3348_s0 + $0x28] sm:$0xf0] }
  0x1a   :  { %656 = vmatpush.bf16.msra.mxu1 %v2522_v13  ;;  %v2502_v40 = vld [vmem:[%s3348_s0 + $0x4] sm:$0xf]  ;;  %v2573_v43 = vld [vmem:[#allocation2 + $0x1f8] sm:$0xff]  ;;  %v1873_v44 = vor.u32 %v2507_v35, %v1872_v34  ;;  %v1865_v45 = vor.u32 %v2506_v37, %v1864_v36  ;;  %v1877_v46 = vor.u32 %v2503_v38, %v1874_v39  ;;  %v2548_v48 = vld [vmem:[#allocation2 + $0x130] sm:$0xff] }
  0x1b   :  { %670 = vmatpush.bf16.msra.mxu2 %v2530_v14  ;;  %v1866_v41 = vld [vmem:[%s3348_s0 + $0x20] sm:$0xf0]  ;;  %v2556_v49 = vld [vmem:[#allocation2 + $0x170] sm:$0xff]  ;;  %v2547_v52 = vld [vmem:[#allocation2 + $0x128] sm:$0xff] }
  0x1c   :  { %684 = vmatpush.bf16.msra.mxu3 %v2538_v15  ;;  %v1869_v47 = vor.u32 %v2502_v40, %v1866_v41  ;;  %v2564_v50 = vld [vmem:[#allocation2 + $0x1b0] sm:$0xff]  ;;  %v2555_v53 = vld [vmem:[#allocation2 + $0x168] sm:$0xff]  ;;  %v2546_v56 = vld [vmem:[#allocation2 + $0x120] sm:$0xff] }
  0x1d   :  { %643 = vmatpush.bf16.msra.mxu0 %v2513_v16  ;;  %v2572_v51 = vld [vmem:[#allocation2 + $0x1f0] sm:$0xff]  ;;  %v2563_v54 = vld [vmem:[#allocation2 + $0x1a8] sm:$0xff]  ;;  %v2554_v57 = vld [vmem:[#allocation2 + $0x160] sm:$0xff] }
  0x1e   :  { %657 = vmatpush.bf16.msra.mxu1 %v2521_v17  ;;  %v2571_v55 = vld [vmem:[#allocation2 + $0x1e8] sm:$0xff]  ;;  %v2562_v58 = vld [vmem:[#allocation2 + $0x1a0] sm:$0xff]  ;;  %v2545_v60 = vld [vmem:[#allocation2 + $0x118] sm:$0xff] }
  0x1f   :  { %671 = vmatpush.bf16.msra.mxu2 %v2529_v18  ;;  %v2570_v59 = vld [vmem:[#allocation2 + $0x1e0] sm:$0xff]  ;;  %v2553_v61 = vld [vmem:[#allocation2 + $0x158] sm:$0xff]  ;;  %v2544_v0 = vld [vmem:[#allocation2 + $0x110] sm:$0xff] }
  0x20   :  { %685 = vmatpush.bf16.msra.mxu3 %v2537_v19  ;;  %v2561_v62 = vld [vmem:[#allocation2 + $0x198] sm:$0xff]  ;;  %v2552_v1 = vld [vmem:[#allocation2 + $0x150] sm:$0xff]  ;;  %v2543_v4 = vld [vmem:[#allocation2 + $0x108] sm:$0xff] }
  0x21   :  { %644 = vmatpush.bf16.msra.mxu0 %v2512_v20  ;;  %v2569_v63 = vld [vmem:[#allocation2 + $0x1d8] sm:$0xff]  ;;  %v2560_v2 = vld [vmem:[#allocation2 + $0x190] sm:$0xff]  ;;  %v2551_v5 = vld [vmem:[#allocation2 + $0x148] sm:$0xff] }
  0x22   :  { %658 = vmatpush.bf16.msra.mxu1 %v2520_v21  ;;  %v2568_v3 = vld [vmem:[#allocation2 + $0x1d0] sm:$0xff]  ;;  %v2559_v6 = vld [vmem:[#allocation2 + $0x188] sm:$0xff]  ;;  %v2542_v8 = vld [vmem:[#allocation2 + $0x100] sm:$0xff] }
  0x23   :  { %672 = vmatpush.bf16.msra.mxu2 %v2528_v22  ;;  %v2567_v7 = vld [vmem:[#allocation2 + $0x1c8] sm:$0xff]  ;;  %v2550_v9 = vld [vmem:[#allocation2 + $0x140] sm:$0xff]  ;;  %v1880_v12 = vld [vmem:[%s3348_s0 + $0x10] sm:$0xf] }
  0x24   :  { %686 = vmatpush.bf16.msra.mxu3 %v2536_v23  ;;  %v2558_v10 = vld [vmem:[#allocation2 + $0x180] sm:$0xff]  ;;  %v2508_v13 = vld [vmem:[%s3348_s0 + $0x2c] sm:$0xf0]  ;;  %v2504_v14 = vld [vmem:[%s3348_s0 + $0x14] sm:$0xf] }
  0x25   :  { %645 = vmatpush.bf16.msra.mxu0 %v2511_v24  ;;  %v2566_v11 = vld [vmem:[#allocation2 + $0x1c0] sm:$0xff]  ;;  %v1882_v15 = vld [vmem:[%s3348_s0 + $0x30] sm:$0xf0]  ;;  %v1888_v16 = vld [vmem:[%s3348_s0 + $0x18] sm:$0xf]  ;;  %v1881_v20 = vor.u32 %v2508_v13, %v1880_v12 }
  0x26   :  { %659 = vmatpush.bf16.msra.mxu1 %v2519_v25  ;;  %v2509_v17 = vld [vmem:[%s3348_s0 + $0x34] sm:$0xf0]  ;;  %v2505_v18 = vld [vmem:[%s3348_s0 + $0x1c] sm:$0xf]  ;;  %v1885_v21 = vor.u32 %v2504_v14, %v1882_v15  ;;  %v2576_v34 = vld [vmem:[%s3352_s4 + $0x10] sm:$0xff] }
  0x27   :  { %673 = vmatpush.bf16.msra.mxu2 %v2527_v26  ;;  %v1890_v19 = vld [vmem:[%s3348_s0 + $0x38] sm:$0xf0]  ;;  %v1889_v22 = vor.u32 %v2509_v17, %v1888_v16  ;;  %v2580_v26 = vld [vmem:[%s3352_s4 + $0x30] sm:$0xff]  ;;  %v2575_v37 = vld [vmem:[%s3352_s4 + $0x8] sm:$0xff] }
  0x28   :  { %687 = vmatpush.bf16.msra.mxu3 %v2535_v27  ;;  %v1893_v23 = vor.u32 %v2505_v18, %v1890_v19  ;;  %v2581_v24 = vld [vmem:[%s3352_s4 + $0x38] sm:$0xff]  ;;  %v2588_v27 = vld [vmem:[%s3354_s6 + $0x30] sm:$0xff]  ;;  %v2583_v38 = vld [vmem:[%s3354_s6 + $0x8] sm:$0xff] }
  0x29   :  { %646 = vmatpush.bf16.msra.mxu0 %v2510_v28  ;;  %v2589_v25 = vld [vmem:[%s3354_s6 + $0x38] sm:$0xff]  ;;  %v2579_v28 = vld [vmem:[%s3352_s4 + $0x28] sm:$0xff]  ;;  %v2584_v35 = vld [vmem:[%s3354_s6 + $0x10] sm:$0xff] }
  0x2a   :  { %660 = vmatpush.bf16.msra.mxu1 %v2518_v29  ;;  %v2587_v29 = vld [vmem:[%s3354_s6 + $0x28] sm:$0xff]  ;;  %v2574_v40 = vld [vmem:[%s3352_s4] sm:$0xff]  ;;  %v2596_v13 = vld [vmem:[%s3356_s8 + $0x30] sm:$0xff] }
  0x2b   :  { %674 = vmatpush.bf16.msra.mxu2 %v2526_v30  ;;  %v2578_v30 = vld [vmem:[%s3352_s4 + $0x20] sm:$0xff]  ;;  %v2595_v14 = vld [vmem:[%s3356_s8 + $0x28] sm:$0xff]  ;;  %v2593_v16 = vld [vmem:[%s3356_s8 + $0x18] sm:$0xff] }
  0x2c   :  { %688 = vmatpush.bf16.msra.mxu3 %v2534_v31  ;;  %647 = vmatmul.bf16.vlgmr.msra.gmra.mxu0 %v1865_v45  ;;  %v2586_v31 = vld [vmem:[%s3354_s6 + $0x20] sm:$0xff]  ;;  %v2592_v17 = vld [vmem:[%s3356_s8 + $0x10] sm:$0xff]  ;;  %v2591_v18 = vld [vmem:[%s3356_s8 + $0x8] sm:$0xff] }
  0x2d   :  { %695 = vmatpush.bf16.msrb.mxu0 %v2549_v32  ;;  %661 = vmatmul.bf16.vlgmr.msra.gmra.mxu1 %v1869_v47  ;;  %v2577_v32 = vld [vmem:[%s3352_s4 + $0x18] sm:$0xff]  ;;  %v2582_v41 = vld [vmem:[%s3354_s6] sm:$0xff] }
  0x2e   :  { %709 = vmatpush.bf16.msrb.mxu1 %v2557_v33  ;;  %675 = vmatmul.bf16.vlgmr.msra.gmra.mxu2 %v1873_v44  ;;  %v2585_v33 = vld [vmem:[%s3354_s6 + $0x18] sm:$0xff]  ;;  %v2594_v15 = vld [vmem:[%s3356_s8 + $0x20] sm:$0xff] }
  0x2f   :  { %723 = vmatpush.bf16.msrb.mxu2 %v2565_v42  ;;  %689 = vmatmul.bf16.vlgmr.msra.gmra.mxu3 %v1877_v46  ;;  %v2668_v42 = vld [vmem:[%s3351_s3] ss:$0 sm:$0xff]  ;;  %v2597_v47 = vld [vmem:[%s3356_s8 + $0x38] sm:$0xff] }
  0x30   :  { %737 = vmatpush.bf16.msrb.mxu3 %v2573_v43  ;;  %v2590_v19 = vld [vmem:[%s3356_s8] sm:$0xff] }
  0x31   :  { %696 = vmatpush.bf16.msrb.mxu0 %v2548_v48 }
  0x32   :  { %710 = vmatpush.bf16.msrb.mxu1 %v2556_v49 }
  0x33   :  { %724 = vmatpush.bf16.msrb.mxu2 %v2564_v50 }
  0x34   :  { %738 = vmatpush.bf16.msrb.mxu3 %v2572_v51 }
  0x35   :  { %697 = vmatpush.bf16.msrb.mxu0 %v2547_v52 }
  0x36   :  { %711 = vmatpush.bf16.msrb.mxu1 %v2555_v53 }
  0x37   :  { %725 = vmatpush.bf16.msrb.mxu2 %v2563_v54 }
  0x38   :  { %739 = vmatpush.bf16.msrb.mxu3 %v2571_v55 }
  0x39   :  { %698 = vmatpush.bf16.msrb.mxu0 %v2546_v56 }
  0x3a   :  { %712 = vmatpush.bf16.msrb.mxu1 %v2554_v57 }
  0x3b   :  { %726 = vmatpush.bf16.msrb.mxu2 %v2562_v58 }
  0x3c   :  { %740 = vmatpush.bf16.msrb.mxu3 %v2570_v59 }
  0x3d   :  { %699 = vmatpush.bf16.msrb.mxu0 %v2545_v60 }
  0x3e   :  { %713 = vmatpush.bf16.msrb.mxu1 %v2553_v61 }
  0x3f   :  { %727 = vmatpush.bf16.msrb.mxu2 %v2561_v62 }
  0x40   :  { %741 = vmatpush.bf16.msrb.mxu3 %v2569_v63 }
  0x41   :  { %700 = vmatpush.bf16.msrb.mxu0 %v2544_v0 }
  0x42   :  { %714 = vmatpush.bf16.msrb.mxu1 %v2552_v1 }
  0x43   :  { %728 = vmatpush.bf16.msrb.mxu2 %v2560_v2 }
  0x44   :  { %742 = vmatpush.bf16.msrb.mxu3 %v2568_v3 }
  0x45   :  { %701 = vmatpush.bf16.msrb.mxu0 %v2543_v4 }
  0x46   :  { %715 = vmatpush.bf16.msrb.mxu1 %v2551_v5 }
  0x47   :  { %729 = vmatpush.bf16.msrb.mxu2 %v2559_v6 }
  0x48   :  { %743 = vmatpush.bf16.msrb.mxu3 %v2567_v7 }
  0x49   :  { %702 = vmatpush.bf16.msrb.mxu0 %v2542_v8 }
  0x4a   :  { %716 = vmatpush.bf16.msrb.mxu1 %v2550_v9 }
  0x4b   :  { %730 = vmatpush.bf16.msrb.mxu2 %v2558_v10 }
  0x4c   :  { %744 = vmatpush.bf16.msrb.mxu3 %v2566_v11  ;;  %703 = vmatmul.bf16.vlgmr.msrb.gmra.mxu0 %v1881_v20  ;;  %v3000_v20 = vld [vmem:[%s3355_s7] ss:$0 sm:$0xff] }
  0x4d   :  { %717 = vmatmul.bf16.vlgmr.msrb.gmra.mxu1 %v1885_v21  ;;  %822 = vmatpush.bf16.msra.mxu0 %v2581_v24  ;;  %v2472_v21 = vld [vmem:[#allocation4 + $0x1c0] sm:$0xf] }
  0x4e   :  { %731 = vmatmul.bf16.vlgmr.msrb.gmra.mxu2 %v1889_v22  ;;  %904 = vmatpush.bf16.msra.mxu1 %v2589_v25  ;;  %v2658_v22 = vld [vmem:[#allocation4 + $0x1dc] sm:$0xf0]  ;;  %v2474_v25 = vld [vmem:[#allocation4 + $0x1e0] sm:$0xf0] }
  0x4f   :  { %745 = vmatmul.bf16.vlgmr.msrb.gmra.mxu3 %v1893_v23  ;;  %1001 = vmatpush.bf16.msra.mxu2 %v2597_v47  ;;  %v2654_v23 = vld [vmem:[#allocation4 + $0x1c4] sm:$0xf]  ;;  %v2473_v24 = vor.u32 %v2658_v22, %v2472_v21  ;;  %v2642_v47 = vld [vmem:[#allocation4 + $0x15c] sm:$0xf0]  ;;  %v2354_v21 = vld [vmem:[#allocation4 + $0xe8] sm:$0xf0] }
  0x50   :  { %v924_v22 = vld [vmem:[%s3349_s1] sm:$0xff] }
  0x51   :  { %823 = vmatpush.bf16.msra.mxu0 %v2580_v26  ;;  %v2480_v26 = vld [vmem:[#allocation4 + $0x1c8] sm:$0xf]  ;;  %1420 = vmatpush.bf16.msra.mxu3 %v2473_v24 }
  0x52   :  { %905 = vmatpush.bf16.msra.mxu1 %v2588_v27  ;;  %v2659_v27 = vld [vmem:[#allocation4 + $0x1e4] sm:$0xf0] }
  0x53   :  { %1002 = vmatpush.bf16.msra.mxu2 %v2596_v13 }
  0x55   :  { %824 = vmatpush.bf16.msra.mxu0 %v2579_v28  ;;  %v2477_v28 = vor.u32 %v2654_v23, %v2474_v25  ;;  %v2312_v25 = vld [vmem:[#allocation4 + $0x80] sm:$0xf] }
  0x56   :  { %906 = vmatpush.bf16.msra.mxu1 %v2587_v29  ;;  %v2481_v29 = vor.u32 %v2659_v27, %v2480_v26  ;;  %v2618_v27 = vld [vmem:[#allocation4 + $0x9c] sm:$0xf0] }
  0x57   :  { %1003 = vmatpush.bf16.msra.mxu2 %v2595_v14 }
  0x59   :  { %825 = vmatpush.bf16.msra.mxu0 %v2578_v30  ;;  %v2655_v30 = vld [vmem:[#allocation4 + $0x1cc] sm:$0xf] }
  0x5a   :  { %907 = vmatpush.bf16.msra.mxu1 %v2586_v31  ;;  %v2482_v31 = vld [vmem:[#allocation4 + $0x1e8] sm:$0xf0] }
  0x5b   :  { %1004 = vmatpush.bf16.msra.mxu2 %v2594_v15  ;;  %v2346_v15 = vld [vmem:[#allocation4 + $0xe0] sm:$0xf0] }
  0x5d   :  { %826 = vmatpush.bf16.msra.mxu0 %v2577_v32  ;;  %v2440_v32 = vld [vmem:[#allocation4 + $0x180] sm:$0xf] }
  0x5e   :  { %908 = vmatpush.bf16.msra.mxu1 %v2585_v33  ;;  %v2485_v33 = vor.u32 %v2655_v30, %v2482_v31 }
  0x5f   :  { %1005 = vmatpush.bf16.msra.mxu2 %v2593_v16  ;;  %v2352_v16 = vld [vmem:[#allocation4 + $0xc8] sm:$0xf] }
  0x61   :  { %827 = vmatpush.bf16.msra.mxu0 %v2576_v34  ;;  %v2650_v34 = vld [vmem:[#allocation4 + $0x19c] sm:$0xf0] }
  0x62   :  { %909 = vmatpush.bf16.msra.mxu1 %v2584_v35  ;;  %v2646_v35 = vld [vmem:[#allocation4 + $0x184] sm:$0xf] }
  0x63   :  { %1006 = vmatpush.bf16.msra.mxu2 %v2592_v17  ;;  %v2627_v17 = vld [vmem:[#allocation4 + $0xe4] sm:$0xf0] }
  0x64   :  { %v2353_v26 = vor.u32 %v2627_v17, %v2352_v16  ;;  %v2496_v16 = vld [vmem:[#allocation4 + $0x1d8] sm:$0xf] }
  0x65   :  { %828 = vmatpush.bf16.msra.mxu0 %v2575_v37  ;;  %v2661_v17 = vld [vmem:[#allocation4 + $0x1f4] sm:$0xf0] }
  0x66   :  { %910 = vmatpush.bf16.msra.mxu1 %v2583_v38  ;;  %v2441_v38 = vor.u32 %v2650_v34, %v2440_v32  ;;  %v2619_v34 = vld [vmem:[#allocation4 + $0xa4] sm:$0xf0] }
  0x67   :  { %1007 = vmatpush.bf16.msra.mxu2 %v2591_v18  ;;  %v2669_v18 = vld [vmem:[%s3353_s5] ss:$0 sm:$0xff] }
  0x68   :  { %1421 = vmatpush.bf16.msra.mxu3 %v2441_v38  ;;  %v2322_v38 = vld [vmem:[#allocation4 + $0xa8] sm:$0xf0] }
  0x69   :  { %829 = vmatpush.bf16.msra.mxu0 %v2574_v40  ;;  %v2448_v40 = vld [vmem:[#allocation4 + $0x188] sm:$0xf] }
  0x6a   :  { %911 = vmatpush.bf16.msra.mxu1 %v2582_v41  ;;  %v2651_v41 = vld [vmem:[#allocation4 + $0x1a4] sm:$0xf0] }
  0x6b   :  { %1008 = vmatpush.bf16.msra.mxu2 %v2590_v19  ;;  %v2623_v19 = vld [vmem:[#allocation4 + $0xcc] sm:$0xf] }
  0x6c   :  { %v2357_v32 = vor.u32 %v2623_v19, %v2354_v21  ;;  %v2497_v19 = vor.u32 %v2661_v17, %v2496_v16  ;;  %v2657_v21 = vld [vmem:[#allocation4 + $0x1dc] sm:$0xf] }
  0x6d   :  { %1434 = vmatpush.bf16.msrb.mxu0 %v2477_v28  ;;  %v2614_v28 = vld [vmem:[#allocation4 + $0x84] sm:$0xf]  ;;  %v2338_v17 = vld [vmem:[#allocation4 + $0xb8] sm:$0xf0] }
  0x6e   :  { %1448 = vmatpush.bf16.msrb.mxu1 %v2481_v29  ;;  %v2314_v29 = vld [vmem:[#allocation4 + $0xa0] sm:$0xf0] }
  0x6f   :  { %1462 = vmatpush.bf16.msrb.mxu2 %v2485_v33  ;;  %v2320_v33 = vld [vmem:[#allocation4 + $0x88] sm:$0xf] }
  0xa9   :  { %v648_v36 = vpop.f32.mrf.mxu0 }
  0xaa   :  { %v662_v39 = vpop.f32.mrf.mxu1  ;;  %v649_v45 = vadd.f32 %v2668_v42, %v648_v36  ;;  %v2442_v36 = vld [vmem:[#allocation4 + $0x1a0] sm:$0xf0] }
  0xac   :  { %v663_v49 = vadd.f32 %v662_v39, %v649_v45  ;;  %v2445_v39 = vor.u32 %v2646_v35, %v2442_v36  ;;  %v2450_v45 = vld [vmem:[#allocation4 + $0x1a8] sm:$0xf0] }
  0xae   :  { %1435 = vmatpush.bf16.msrb.mxu0 %v2445_v39  ;;  %v2313_v39 = vor.u32 %v2618_v27, %v2312_v25  ;;  %v2652_v25 = vld [vmem:[#allocation4 + $0x1ac] sm:$0xf0]  ;;  %v2458_v27 = vld [vmem:[#allocation4 + $0x1b0] sm:$0xf0] }
  0xb1   :  { %v676_v43 = vpop.f32.mrf.mxu2  ;;  %v650_v46 = vpop.f32.mrf.mxu0 }
  0xb2   :  { %v690_v44 = vpop.f32.mrf.mxu3  ;;  %v664_v48 = vpop.f32.mrf.mxu1  ;;  %v651_v50 = vadd.f32 %v2668_v42, %v650_v46  ;;  %v677_v53 = vadd.f32 %v676_v43, %v663_v49  ;;  %v2647_v42 = vld [vmem:[#allocation4 + $0x18c] sm:$0xf]  ;;  %v2408_v46 = vld [vmem:[#allocation4 + $0x140] sm:$0xf]  ;;  %v2638_v49 = vld [vmem:[#allocation4 + $0x144] sm:$0xf] }
  0xb4   :  { %v665_v54 = vadd.f32 %v664_v48, %v651_v50  ;;  %v691_v57 = vadd.f32 %v690_v44, %v677_v53  ;;  %v2449_v44 = vor.u32 %v2651_v41, %v2448_v40  ;;  %v2453_v48 = vor.u32 %v2647_v42, %v2450_v45  ;;  %v2410_v50 = vld [vmem:[#allocation4 + $0x160] sm:$0xf0] }
  0xb5   :  { %v2409_v53 = vor.u32 %v2642_v47, %v2408_v46  ;;  %v2317_v41 = vor.u32 %v2614_v28, %v2314_v29  ;;  %v2321_v42 = vor.u32 %v2619_v34, %v2320_v33  ;;  %v2606_v45 = vld [vmem:[#allocation4 + $0x44] sm:$0xf]  ;;  %v2464_v28 = vld [vmem:[#allocation4 + $0x198] sm:$0xf]  ;;  %v2466_v33 = vld [vmem:[#allocation4 + $0x1b8] sm:$0xf0] }
  0xb6   :  { %1449 = vmatpush.bf16.msrb.mxu1 %v2449_v44  ;;  %1463 = vmatpush.bf16.msrb.mxu2 %v2453_v48  ;;  %v2610_v44 = vld [vmem:[#allocation4 + $0x5c] sm:$0xf0]  ;;  %v2282_v47 = vld [vmem:[#allocation4 + $0x60] sm:$0xf0]  ;;  %v2288_v48 = vld [vmem:[#allocation4 + $0x48] sm:$0xf] }
  0xb7   :  { %1422 = vmatpush.bf16.msra.mxu3 %v2409_v53  ;;  %v925_v53 = vld [vmem:[%s3349_s1 + $0x8] sm:$0xff]  ;;  %v2653_v29 = vld [vmem:[#allocation4 + $0x1b4] sm:$0xf0] }
  0xb9   :  { %v678_v51 = vpop.f32.mrf.mxu2 }
  0xba   :  { %v692_v52 = vpop.f32.mrf.mxu3  ;;  %v679_v58 = vadd.f32 %v678_v51, %v665_v54  ;;  %v2416_v51 = vld [vmem:[#allocation4 + $0x148] sm:$0xf] }
  0xbb   :  { %v2643_v54 = vld [vmem:[#allocation4 + $0x164] sm:$0xf0] }
  0xbc   :  { %v693_v62 = vadd.f32 %v692_v52, %v679_v58  ;;  %v2418_v58 = vld [vmem:[#allocation4 + $0x168] sm:$0xf0] }
  0xc9   :  { %v704_v55 = vpop.f32.mrf.mxu0 }
  0xca   :  { %v718_v56 = vpop.f32.mrf.mxu1  ;;  %v705_v59 = vadd.f32 %v704_v55, %v691_v57  ;;  %v2639_v55 = vld [vmem:[#allocation4 + $0x14c] sm:$0xf]  ;;  %v2417_v57 = vor.u32 %v2643_v54, %v2416_v51 }
  0xcb   :  { %v2290_v51 = vld [vmem:[#allocation4 + $0x68] sm:$0xf0] }
  0xcc   :  { %v719_v0 = vadd.f32 %v718_v56, %v705_v59  ;;  %v2413_v56 = vor.u32 %v2638_v49, %v2410_v50  ;;  %v2376_v59 = vld [vmem:[#allocation4 + $0x100] sm:$0xf]  ;;  %1450 = vmatpush.bf16.msrb.mxu1 %v2417_v57  ;;  %v2611_v49 = vld [vmem:[#allocation4 + $0x64] sm:$0xf0]  ;;  %v2607_v50 = vld [vmem:[#allocation4 + $0x4c] sm:$0xf] }
  0xcd   :  { %v2248_v57 = vld [vmem:[#allocation4] sm:$0xf] }
  0xce   :  { %1436 = vmatpush.bf16.msrb.mxu0 %v2413_v56  ;;  %v2289_v56 = vor.u32 %v2611_v49, %v2288_v48  ;;  %v2636_v48 = vld [vmem:[#allocation4 + $0x12c] sm:$0xf0]  ;;  %v2632_v49 = vld [vmem:[#allocation4 + $0x114] sm:$0xf] }
  0xd1   :  { %v732_v60 = vpop.f32.mrf.mxu2  ;;  %v706_v63 = vpop.f32.mrf.mxu0 }
  0xd2   :  { %v746_v61 = vpop.f32.mrf.mxu3  ;;  %v707_v1 = vadd.f32 %v706_v63, %v693_v62  ;;  %v733_v2 = vadd.f32 %v732_v60, %v719_v0  ;;  %v720_v3 = vpop.f32.mrf.mxu1  ;;  %v2634_v60 = vld [vmem:[#allocation4 + $0x11c] sm:$0xf0]  ;;  %v2421_v62 = vor.u32 %v2639_v55, %v2418_v58  ;;  %v2630_v63 = vld [vmem:[#allocation4 + $0x104] sm:$0xf]  ;;  %v2285_v55 = vor.u32 %v2606_v45, %v2282_v47  ;;  %v2434_v45 = vld [vmem:[#allocation4 + $0x178] sm:$0xf0] }
  0xd3   :  { %v2378_v0 = vld [vmem:[#allocation4 + $0x120] sm:$0xf0]  ;;  %v2602_v58 = vld [vmem:[#allocation4 + $0x1c] sm:$0xf0]  ;;  %v2392_v47 = vld [vmem:[#allocation4 + $0x110] sm:$0xf] }
  0xd4   :  { %v721_v4 = vadd.f32 %v720_v3, %v707_v1  ;;  %v747_v6 = vadd.f32 %v746_v61, %v733_v2  ;;  %v2384_v1 = vld [vmem:[#allocation4 + $0x108] sm:$0xf]  ;;  %v2631_v3 = vld [vmem:[#allocation4 + $0x10c] sm:$0xf]  ;;  %1464 = vmatpush.bf16.msrb.mxu2 %v2421_v62  ;;  %v2250_v62 = vld [vmem:[#allocation4 + $0x20] sm:$0xf0] }
  0xd5   :  { %v2635_v2 = vld [vmem:[#allocation4 + $0x124] sm:$0xf0] }
  0xd6   :  { %v751_v10 = vmax.f32 %v747_v6, 0.0 }
  0xd9   :  { %v734_v5 = vpop.f32.mrf.mxu2 }
  0xda   :  { %v735_v7 = vadd.f32 %v734_v5, %v721_v4  ;;  %v748_v8 = vpop.f32.mrf.mxu3  ;;  %v2377_v4 = vor.u32 %v2634_v60, %v2376_v59  ;;  %v2386_v5 = vld [vmem:[#allocation4 + $0x128] sm:$0xf0]  ;;  %v2293_v60 = vor.u32 %v2607_v50, %v2290_v51  ;;  %v2393_v50 = vor.u32 %v2636_v48, %v2392_v47  ;;  %v2394_v51 = vld [vmem:[#allocation4 + $0x130] sm:$0xf0] }
  0xdb   :  { %v2389_v14 = vor.u32 %v2631_v3, %v2386_v5  ;;  %v2599_v3 = vld [vmem:[#allocation4 + $0xc] sm:$0xf]  ;;  %v2249_v5 = vor.u32 %v2602_v58, %v2248_v57  ;;  %v2402_v57 = vld [vmem:[#allocation4 + $0x138] sm:$0xf0] }
  0xdc   :  { %v749_v9 = vadd.f32 %v748_v8, %v735_v7  ;;  %v2381_v7 = vor.u32 %v2630_v63, %v2378_v0  ;;  %v2385_v8 = vor.u32 %v2635_v2, %v2384_v1  ;;  %1423 = vmatpush.bf16.msra.mxu3 %v2377_v4  ;;  %v2256_v63 = vld [vmem:[#allocation4 + $0x8] sm:$0xf]  ;;  %v2258_v4 = vld [vmem:[#allocation4 + $0x28] sm:$0xf0] }
  0xdd   :  { %1465 = vmatpush.bf16.msrb.mxu2 %v2389_v14  ;;  %v2603_v2 = vld [vmem:[#allocation4 + $0x24] sm:$0xf0] }
  0xde   :  { %v752_v11 = vmax.f32 %v749_v9, 0.0  ;;  %v2344_v9 = vld [vmem:[#allocation4 + $0xc0] sm:$0xf]  ;;  %1437 = vmatpush.bf16.msrb.mxu0 %v2381_v7  ;;  %1451 = vmatpush.bf16.msrb.mxu1 %v2385_v8  ;;  %v2257_v8 = vor.u32 %v2603_v2, %v2256_v63  ;;  %v2362_v63 = vld [vmem:[#allocation4 + $0xf0] sm:$0xf0] }
  0xe0   :  { %v753_v12 = vpack.c.bf16 %v752_v11, %v751_v10  ;;  %v2626_v10 = vld [vmem:[#allocation4 + $0xdc] sm:$0xf0]  ;;  %v2622_v11 = vld [vmem:[#allocation4 + $0xc4] sm:$0xf] }
  0xe1   :  { %v2345_v24 = vor.u32 %v2626_v10, %v2344_v9  ;;  %1466 = vmatpush.bf16.msrb.mxu2 %v2357_v32  ;;  %v2261_v9 = vor.u32 %v2599_v3, %v2258_v4  ;;  %v2649_v32 = vld [vmem:[#allocation4 + $0x19c] sm:$0xf] }
  0xe2   :  { %830 = vmatmul.bf16.vlgmr.msra.gmra.mxu0 %v753_v12  ;;  %912 = vmatmul.bf16.vlgmr.msra.gmra.mxu1 %v753_v12  ;;  %v2469_v34 = vor.u32 %v2649_v32, %v2466_v33  ;;  %v2625_v4 = vld [vmem:[#allocation4 + $0xdc] sm:$0xf]  ;;  %v2600_v32 = vld [vmem:[#allocation4 + $0x14] sm:$0xf] }
  0xe3   :  { %1424 = vmatpush.bf16.msra.mxu3 %v2345_v24  ;;  %1452 = vmatpush.bf16.msrb.mxu1 %v2353_v26  ;;  %v2456_v24 = vld [vmem:[#allocation4 + $0x190] sm:$0xf] }
  0xe4   :  { %v2457_v26 = vor.u32 %v2652_v25, %v2456_v24  ;;  %v2304_v24 = vld [vmem:[#allocation4 + $0x58] sm:$0xf] }
  0xe7   :  { %1425 = vmatpush.bf16.msra.mxu3 %v2313_v39  ;;  %1453 = vmatpush.bf16.msrb.mxu1 %v2321_v42  ;;  %v2426_v39 = vld [vmem:[#allocation4 + $0x170] sm:$0xf0] }
  0xeb   :  { %1454 = vmatpush.bf16.msrb.mxu1 %v2289_v56  ;;  %v2633_v56 = vld [vmem:[#allocation4 + $0x11c] sm:$0xf] }
  0xec   :  { %v2405_v58 = vor.u32 %v2633_v56, %v2402_v57 }
  0xef   :  { %1455 = vmatpush.bf16.msrb.mxu1 %v2257_v8  ;;  %v2620_v8 = vld [vmem:[#allocation4 + $0xac] sm:$0xf0] }
  0xf3   :  { %1504 = vmatpush.bf16.msra.mxu1 %v2497_v19  ;;  %v2612_v19 = vld [vmem:[#allocation4 + $0x6c] sm:$0xf0] }
 0x15f   :  { %v913_v37 = vpop.f32.mrf.mxu1  ;;  %v831_v12 = vpop.f32.mrf.mxu0 }
 0x160   :  { %v914_v43 = vadd.f32 %v3000_v20, %v913_v37  ;;  %v832_v35 = vadd.f32 %v2669_v18, %v831_v12  ;;  %v2615_v37 = vld [vmem:[#allocation4 + $0x8c] sm:$0xf]  ;;  %v2660_v12 = vld [vmem:[#allocation4 + $0x1ec] sm:$0xf0] }
 0x161   :  { %v2325_v46 = vor.u32 %v2615_v37, %v2322_v38  ;;  %v2640_v37 = vld [vmem:[#allocation4 + $0x154] sm:$0xf] }
 0x162   :  { %v918_v52 = vmul.f32 0.5, %v914_v43  ;;  %v2280_v43 = vld [vmem:[#allocation4 + $0x40] sm:$0xf]  ;;  %v2429_v42 = vor.u32 %v2640_v37, %v2426_v39  ;;  %v2601_v37 = vld [vmem:[#allocation4 + $0x1c] sm:$0xf] }
 0x163   :  { %v2281_v54 = vor.u32 %v2610_v44, %v2280_v43  ;;  %1467 = vmatpush.bf16.msrb.mxu2 %v2325_v46  ;;  %v2641_v44 = vld [vmem:[#allocation4 + $0x15c] sm:$0xf] }
 0x164   :  { %v920_v61 = vmul.f32 1.442695, %v918_v52  ;;  %v2437_v46 = vor.u32 %v2641_v44, %v2434_v45  ;;  %v2671_v44 = vld [vmem:[%s3357_s9] ss:$0 sm:$0xff] }
 0x165   :  { %1426 = vmatpush.bf16.msra.mxu3 %v2281_v54  ;;  %v2397_v54 = vor.u32 %v2632_v49, %v2394_v51  ;;  %v3025_v51 = vld [vmem:[%s3359_s11] sm:$0xff] }
 0x166   :  { %2672 = vpow2.f32 %v920_v61  ;;  %v2598_v61 = vld [vmem:[#allocation4 + $0x4] sm:$0xf] }
 0x167   :  { %v915_v6 = vpop.f32.mrf.mxu1  ;;  %v833_v52 = vpop.f32.mrf.mxu0  ;;  %v2253_v7 = vor.u32 %v2598_v61, %v2250_v62  ;;  %1468 = vmatpush.bf16.msrb.mxu2 %v2293_v60  ;;  %v2628_v60 = vld [vmem:[#allocation4 + $0xec] sm:$0xf0]  ;;  %v2624_v61 = vld [vmem:[#allocation4 + $0xd4] sm:$0xf] }
 0x168   :  { %v916_v13 = vadd.f32 %v3000_v20, %v915_v6  ;;  %v2349_v20 = vor.u32 %v2622_v11, %v2346_v15  ;;  %v834_v0 = vadd.f32 %v2669_v18, %v833_v52  ;;  %v2488_v11 = vld [vmem:[#allocation4 + $0x1d0] sm:$0xf]  ;;  %v2490_v15 = vld [vmem:[#allocation4 + $0x1f0] sm:$0xf0]  ;;  %v2400_v52 = vld [vmem:[#allocation4 + $0x118] sm:$0xf]  ;;  %v2365_v2 = vor.u32 %v2624_v61, %v2362_v63 }
 0x169   :  { %1427 = vmatpush.bf16.msra.mxu3 %v2249_v5  ;;  %v2489_v14 = vor.u32 %v2660_v12, %v2488_v11  ;;  %v2370_v5 = vld [vmem:[#allocation4 + $0xf8] sm:$0xf0]  ;;  %v1087_v61 = vperm.slane %v3025_v51, 3 }
 0x16a   :  { %v919_v23 = vmul.f32 0.5, %v916_v13  ;;  %1438 = vmatpush.bf16.msrb.mxu0 %v2349_v20  ;;  %v2656_v13 = vld [vmem:[#allocation4 + $0x1d4] sm:$0xf] }
 0x16b   :  { %1469 = vmatpush.bf16.msrb.mxu2 %v2261_v9  ;;  %v2493_v18 = vor.u32 %v2656_v13, %v2490_v15  ;;  %v2648_v20 = vld [vmem:[#allocation4 + $0x194] sm:$0xf]  ;;  %v2336_v13 = vld [vmem:[#allocation4 + $0x98] sm:$0xf]  ;;  %v2617_v15 = vld [vmem:[#allocation4 + $0x9c] sm:$0xf] }
 0x16c   :  { %v2673_v30 = vpop.eup %2672  ;;  %v922_v31 = vmul.f32 1.442695, %v919_v23  ;;  %v2616_v9 = vld [vmem:[#allocation4 + $0x94] sm:$0xf] }
 0x16d   :  { %v926_v36 = vmul.f32 %v2673_v30, %v924_v22  ;;  %v2498_v22 = vld [vmem:[#allocation4 + $0x1f8] sm:$0xf0]  ;;  %1476 = vmatpush.bf16.msrb.mxu3 %v2489_v14  ;;  %v2461_v30 = vor.u32 %v2648_v20, %v2458_v27  ;;  %v2621_v14 = vld [vmem:[#allocation4 + $0xb4] sm:$0xf0] }
 0x16e   :  { %2674 = vpow2.f32 %v922_v31  ;;  %1439 = vmatpush.bf16.msrb.mxu0 %v2317_v41  ;;  %v2501_v23 = vor.u32 %v2657_v21, %v2498_v22  ;;  %v2465_v31 = vor.u32 %v2653_v29, %v2464_v28  ;;  %v2645_v41 = vld [vmem:[#allocation4 + $0x174] sm:$0xf0]  ;;  %v2337_v16 = vor.u32 %v2621_v14, %v2336_v13  ;;  %v2608_v22 = vld [vmem:[#allocation4 + $0x54] sm:$0xf]  ;;  %v2306_v27 = vld [vmem:[#allocation4 + $0x78] sm:$0xf0] }
 0x16f   :  { %v928_v40 = vadd.f32 %v926_v36, %v832_v35  ;;  %v2424_v35 = vld [vmem:[#allocation4 + $0x150] sm:$0xf]  ;;  %v2341_v21 = vor.u32 %v2617_v15, %v2338_v17  ;;  %v2613_v20 = vld [vmem:[#allocation4 + $0x74] sm:$0xf0] }
 0x170   :  { %1505 = vmatpush.bf16.msra.mxu1 %v2465_v31  ;;  %v2644_v36 = vld [vmem:[#allocation4 + $0x16c] sm:$0xf0]  ;;  %v2305_v29 = vor.u32 %v2613_v20, %v2304_v24 }
 0x171   :  { %930 = vst [vmem:[%s3361_s13] sm:$0xff] %v928_v40  ;;  %1477 = vmatpush.bf16.msrb.mxu3 %v2457_v26  ;;  %v2425_v38 = vor.u32 %v2644_v36, %v2424_v35  ;;  %v2609_v26 = vld [vmem:[#allocation4 + $0x5c] sm:$0xf]  ;;  %v2604_v31 = vld [vmem:[#allocation4 + $0x2c] sm:$0xf0]  ;;  %v2272_v35 = vld [vmem:[#allocation4 + $0x18] sm:$0xf] }
 0x172   :  { %1440 = vmatpush.bf16.msrb.mxu0 %v2285_v55  ;;  %v2309_v33 = vor.u32 %v2609_v26, %v2306_v27  ;;  %v2605_v36 = vld [vmem:[#allocation4 + $0x34] sm:$0xf0] }
 0x174   :  { %v2675_v59 = vpop.eup %2674 }
 0x175   :  { %v927_v1 = vmul.f32 %v2675_v59, %v925_v53  ;;  %1478 = vmatpush.bf16.msrb.mxu3 %v2425_v38  ;;  %v2637_v53 = vld [vmem:[#allocation4 + $0x134] sm:$0xf0]  ;;  %v2360_v59 = vld [vmem:[#allocation4 + $0xd0] sm:$0xf]  ;;  %v2274_v38 = vld [vmem:[#allocation4 + $0x38] sm:$0xf0] }
 0x176   :  { %1441 = vmatpush.bf16.msrb.mxu0 %v2253_v7  ;;  %v2401_v55 = vor.u32 %v2637_v53, %v2400_v52  ;;  %v2361_v62 = vor.u32 %v2628_v60, %v2360_v59  ;;  %v2373_v7 = vor.u32 %v2625_v4, %v2370_v5  ;;  %v1085_v52 = vperm.slane %v3025_v51, 1 }
 0x177   :  { %v929_v6 = vadd.f32 %v927_v1, %v834_v0  ;;  %v2368_v0 = vld [vmem:[#allocation4 + $0xd8] sm:$0xf]  ;;  %v1086_v53 = vperm.slane %v3025_v51, 2  ;;  %v1084_v59 = vperm.slane %v3025_v51, 0 }
 0x178   :  { %v2629_v1 = vld [vmem:[#allocation4 + $0xf4] sm:$0xf0] }
 0x179   :  { %931 = vst [vmem:[%s3361_s13 + $0x8] sm:$0xff] %v929_v6  ;;  %v932_v10 = vpack.c.bf16 %v929_v6, %v928_v40  ;;  %v2432_v40 = vld [vmem:[#allocation4 + $0x158] sm:$0xf]  ;;  %1479 = vmatpush.bf16.msrb.mxu3 %v2393_v50  ;;  %v2369_v3 = vor.u32 %v2629_v1, %v2368_v0  ;;  %v2328_v6 = vld [vmem:[#allocation4 + $0x90] sm:$0xf] }
 0x17a   :  { %1490 = vmatpush.bf16.msra.mxu0 %v2493_v18  ;;  %v2433_v43 = vor.u32 %v2645_v41, %v2432_v40  ;;  %v2329_v11 = vor.u32 %v2620_v8, %v2328_v6  ;;  %v2296_v18 = vld [vmem:[#allocation4 + $0x50] sm:$0xf]  ;;  %v2273_v41 = vor.u32 %v2605_v36, %v2272_v35  ;;  %v1090_v35 = vperm.slane %v3025_v51, 6 }
 0x17b   :  { %1009 = vmatmul.bf16.vlgmr.msra.gmra.mxu2 %v932_v10  ;;  %v2330_v10 = vld [vmem:[#allocation4 + $0xb0] sm:$0xf0]  ;;  %v2297_v25 = vor.u32 %v2612_v19, %v2296_v18  ;;  %v1088_v36 = vperm.slane %v3025_v51, 4 }
 0x17c   :  { %1518 = vmatpush.bf16.msra.mxu2 %v2501_v23  ;;  %1506 = vmatpush.bf16.msra.mxu1 %v2433_v43  ;;  %v2333_v12 = vor.u32 %v2616_v9, %v2330_v10  ;;  %v2298_v23 = vld [vmem:[#allocation4 + $0x70] sm:$0xf0] }
 0x17d   :  { %1480 = vmatpush.bf16.msrb.mxu3 %v2361_v62  ;;  %v2301_v28 = vor.u32 %v2608_v22, %v2298_v23 }
 0x17e   :  { %1491 = vmatpush.bf16.msra.mxu0 %v2461_v30  ;;  %v2264_v30 = vld [vmem:[#allocation4 + $0x10] sm:$0xf] }
 0x17f   :  { %v2265_v39 = vor.u32 %v2604_v31, %v2264_v30 }
 0x180   :  { %1519 = vmatpush.bf16.msra.mxu2 %v2469_v34  ;;  %1507 = vmatpush.bf16.msra.mxu1 %v2401_v55  ;;  %v2266_v34 = vld [vmem:[#allocation4 + $0x30] sm:$0xf0] }
 0x181   :  { %1481 = vmatpush.bf16.msrb.mxu3 %v2329_v11  ;;  %v2269_v40 = vor.u32 %v2600_v32, %v2266_v34 }
 0x182   :  { %1492 = vmatpush.bf16.msra.mxu0 %v2429_v42  ;;  %v2277_v42 = vor.u32 %v2601_v37, %v2274_v38 }
 0x184   :  { %1520 = vmatpush.bf16.msra.mxu2 %v2437_v46  ;;  %1508 = vmatpush.bf16.msra.mxu1 %v2369_v3 }
 0x185   :  { %1482 = vmatpush.bf16.msrb.mxu3 %v2297_v25 }
 0x186   :  { %1493 = vmatpush.bf16.msra.mxu0 %v2397_v54 }
 0x188   :  { %1521 = vmatpush.bf16.msra.mxu2 %v2405_v58  ;;  %1509 = vmatpush.bf16.msra.mxu1 %v2337_v16 }
 0x189   :  { %1483 = vmatpush.bf16.msrb.mxu3 %v2265_v39 }
 0x18a   :  { %1494 = vmatpush.bf16.msra.mxu0 %v2365_v2 }
 0x18c   :  { %1522 = vmatpush.bf16.msra.mxu2 %v2373_v7  ;;  %1510 = vmatpush.bf16.msra.mxu1 %v2305_v29 }
 0x18e   :  { %1495 = vmatpush.bf16.msra.mxu0 %v2333_v12 }
 0x190   :  { %1523 = vmatpush.bf16.msra.mxu2 %v2341_v21  ;;  %1511 = vmatpush.bf16.msra.mxu1 %v2273_v41 }
 0x192   :  { %1496 = vmatpush.bf16.msra.mxu0 %v2301_v28  ;;  %v1089_v28 = vperm.slane %v3025_v51, 5 }
 0x194   :  { %1524 = vmatpush.bf16.msra.mxu2 %v2309_v33 }
 0x196   :  { %1497 = vmatpush.bf16.msra.mxu0 %v2269_v40 }
 0x198   :  { %1525 = vmatpush.bf16.msra.mxu2 %v2277_v42 }
 0x1fe   :  { %v1010_v43 = vpop.f32.mrf.mxu2 }
 0x1ff   :  { %v1011_v45 = vadd.f32 %v2671_v44, %v1010_v43 }
 0x201   :  { %v1015_v48 = vmax.f32 %v1011_v45, 0.0 }
 0x206   :  { %v1012_v46 = vpop.f32.mrf.mxu2 }
 0x207   :  { %v1013_v47 = vadd.f32 %v2671_v44, %v1012_v46 }
 0x209   :  { %v1016_v49 = vmax.f32 %v1013_v47, 0.0 }
 0x20b   :  { %v1017_v50 = vpack.c.bf16 %v1016_v49, %v1015_v48 }
 0x20d   :  { %1428 = vmatmul.bf16.vlgmr.msra.gmra.mxu3 %v1017_v50  ;;  %1442 = vmatmul.bf16.vlgmr.msrb.gmra.mxu0 %v1017_v50 }
 0x20e   :  { %1456 = vmatmul.bf16.vlgmr.msrb.gmra.mxu1 %v1017_v50  ;;  %1470 = vmatmul.bf16.vlgmr.msrb.gmra.mxu2 %v1017_v50 }
 0x21d   :  { %1484 = vmatmul.bf16.vlgmr.msrb.gmra.mxu3 %v1017_v50  ;;  %1498 = vmatmul.bf16.vlgmr.msra.gmra.mxu0 %v1017_v50 }
 0x21e   :  { %1512 = vmatmul.bf16.vlgmr.msra.gmra.mxu1 %v1017_v50  ;;  %1526 = vmatmul.bf16.vlgmr.msra.gmra.mxu2 %v1017_v50 }
 0x28a   :  { %v1443_v54 = vpop.f32.mrf.mxu0 }
 0x28b   :  { %v1444_v55 = vadd.f32 %v1443_v54, %v1085_v52  ;;  %v1457_v56 = vpop.f32.mrf.mxu1 }
 0x28c   :  { %v1458_v57 = vadd.f32 %v1457_v56, %v1086_v53 }
 0x28d   :  { %v1533_v58 = vsub.f32 0.0, %v1444_v55 }
 0x28e   :  { %v1534_v60 = vsub.f32 0.0, %v1458_v57 }
 0x28f   :  { %v1550_v62 = vmul.f32 1.442695, %v1533_v58 }
 0x290   :  { %v1552_v63 = vmul.f32 1.442695, %v1534_v60  ;;  %v1429_v0 = vpop.f32.mrf.mxu3 }
 0x291   :  { %2676 = vpow2.f32 %v1550_v62  ;;  %v1430_v1 = vadd.f32 %v1429_v0, %v1084_v59  ;;  %v1471_v2 = vpop.f32.mrf.mxu2 }
 0x292   :  { %2678 = vpow2.f32 %v1552_v63  ;;  %v1472_v3 = vadd.f32 %v1471_v2, %v1087_v61  ;;  %v1445_v4 = vpop.f32.mrf.mxu0 }
 0x293   :  { %v1532_v5 = vsub.f32 0.0, %v1430_v1  ;;  %v1446_v6 = vadd.f32 %v1445_v4, %v1085_v52  ;;  %v1459_v7 = vpop.f32.mrf.mxu1  ;;  %v1091_v52 = vperm.slane %v3025_v51, 7 }
 0x294   :  { %v1535_v8 = vsub.f32 0.0, %v1472_v3  ;;  %v1460_v9 = vadd.f32 %v1459_v7, %v1086_v53 }
 0x295   :  { %v1548_v10 = vmul.f32 1.442695, %v1532_v5  ;;  %v1541_v11 = vsub.f32 0.0, %v1446_v6 }
 0x296   :  { %v1554_v12 = vmul.f32 1.442695, %v1535_v8  ;;  %v1542_v13 = vsub.f32 0.0, %v1460_v9 }
 0x297   :  { %v2677_v14 = vpop.eup %2676  ;;  %2680 = vpow2.f32 %v1548_v10  ;;  %v1566_v15 = vmul.f32 1.442695, %v1541_v11 }
 0x298   :  { %v2679_v16 = vpop.eup %2678  ;;  %v3031_v17 = vadd.f32 1.0, %v2677_v14  ;;  %2682 = vpow2.f32 %v1554_v12  ;;  %v1568_v18 = vmul.f32 1.442695, %v1542_v13  ;;  %v1431_v19 = vpop.f32.mrf.mxu3 }
 0x299   :  { %v3033_v21 = vadd.f32 1.0, %v2679_v16  ;;  %2684 = vpow2.f32 %v1566_v15  ;;  %v1432_v22 = vadd.f32 %v1431_v19, %v1084_v59  ;;  %v1473_v31 = vpop.f32.mrf.mxu2 }
 0x29a   :  { %2686 = vrcp.f32 %v3031_v17  ;;  %v1499_v32 = vpop.f32.mrf.mxu0  ;;  %v1620_v38 = vand.u32 2147483647, %v3031_v17  ;;  %v1622_v39 = vand.u32 2147483648, %v3031_v17  ;;  %v1474_v44 = vadd.f32 %v1473_v31, %v1087_v61 }
 0x29b   :  { %2688 = vrcp.f32 %v3033_v21  ;;  %v1540_v23 = vsub.f32 0.0, %v1432_v22  ;;  %v1637_v41 = vand.u32 2147483648, %v3033_v21  ;;  %v3061_v45 = vadd.f32 %v1499_v32, %v1089_v28  ;;  %v1513_v49 = vpop.f32.mrf.mxu1 }
 0x29c   :  { %2690 = vpow2.f32 %v1568_v18  ;;  %v1635_v47 = vand.u32 2147483647, %v3033_v21  ;;  %vm1616_vm0 = vweird.f32 %v3031_v17  ;;  %v1623_v54 = vor.u32 1.1754944e-38, %v1622_v39 }
 0x29d   :  { %v2681_v24 = vpop.eup %2680  ;;  %v1564_v30 = vmul.f32 1.442695, %v1540_v23  ;;  %vm1631_vm1 = vweird.f32 %v3033_v21  ;;  %v1638_v56 = vor.u32 1.1754944e-38, %v1637_v41  ;;  %vm3072_vm2 = vcmp.eq.f32.partialorder %v1620_v38, 8.507059e+37 }
 0x29e   :  { %v2683_v25 = vpop.eup %2682  ;;  %v3037_v20 = vadd.f32 1.0, %v2681_v24  ;;  %v1543_v60 = vsub.f32 0.0, %v1474_v44  ;;  %v1537_v61 = vsub.f32 0.0, %v3061_v45  ;;  %v3080_v62 = vadd.f32 %v1513_v49, %v1090_v35 }
 0x29f   :  { %v2685_v26 = vpop.eup %2684  ;;  %v3039_v27 = vadd.f32 1.0, %v2683_v25  ;;  %vm3082_vm3 = vcmp.eq.f32.partialorder %v1635_v47, 8.507059e+37 }
 0x2a0   :  { %v3042_v29 = vpop.eup %2686  ;;  %2692 = vrcp.f32 %v3037_v20  ;;  %v3057_v43 = vadd.f32 1.0, %v2685_v26  ;;  %vm1601_vm4 = vweird.f32 %v3037_v20  ;;  %v1605_v0 = vand.u32 2147483647, %v3037_v20  ;;  %v1485_v32 = vpop.f32.mrf.mxu3 }
 0x2a1   :  { %v3045_v33 = vpop.eup %2688  ;;  %v1612_v34 = vmul.f32 %v3042_v29, %v3031_v17  ;;  %2694 = vrcp.f32 %v3039_v27  ;;  %vm1617_vm5 = vweird.f32 %v3042_v29  ;;  %v1607_v4 = vand.u32 2147483648, %v3037_v20 }
 0x2a2   :  { %v2691_v37 = vpop.eup %2690  ;;  %v1627_v40 = vmul.f32 %v3045_v33, %v3033_v21  ;;  %2696 = vpow2.f32 %v1564_v30  ;;  %vm1632_vm6 = vweird.f32 %v3045_v33  ;;  %v1652_v8 = vand.u32 2147483648, %v3039_v27  ;;  %vm3102_vm8 = vmor %vm1616_vm0, %vm1617_vm5  ;;  %v1501_v39 = vpop.f32.mrf.mxu0 }
 0x2a3   :  { %v1613_v42 = vsub.f32 1.0, %v1612_v34  ;;  %v3064_v48 = vadd.f32 1.0, %v2691_v37  ;;  %2698 = vrcp.f32 %v3057_v43  ;;  %v1570_v12 = vmul.f32 1.442695, %v1543_v60  ;;  %vm3114_vm10 = vmor %vm1631_vm1, %vm1632_vm6 }
 0x2a4   :  { %v1628_v46 = vsub.f32 1.0, %v1627_v40  ;;  %v1650_v15 = vand.u32 2147483647, %v3039_v27  ;;  %vm1646_vm11 = vweird.f32 %v3039_v27  ;;  %v1608_v21 = vor.u32 1.1754944e-38, %v1607_v4 }
 0x2a5   :  { %v1614_v50 = vmul.f32 %v3042_v29, %v1613_v42  ;;  %2700 = vrcp.f32 %v3064_v48  ;;  %vm1606_vm13 = vcmp.eq.f32.partialorder %v1605_v0, 8.507059e+37  ;;  %vm1736_vm0 = vweird.f32 %v3057_v43 }
 0x2a6   :  { %v2693_v53 = vpop.eup %2692  ;;  %v1629_v55 = vmul.f32 %v3045_v33, %v1628_v46  ;;  %vm1651_vm15 = vcmp.eq.f32.partialorder %v1650_v15, 8.507059e+37  ;;  %v1558_v42 = vmul.f32 1.442695, %v1537_v61  ;;  %v1740_v45 = vand.u32 2147483647, %v3057_v43 }
 0x2a7   :  { %v2695_v57 = vpop.eup %2694  ;;  %v1597_v59 = vmul.f32 %v2693_v53, %v3037_v20  ;;  %v1615_v2 = vadd.f32 %v3042_v29, %v1614_v50  ;;  %vm1602_vm7 = vweird.f32 %v2693_v53  ;;  %v1538_v46 = vsub.f32 0.0, %v3080_v62 }
 0x2a8   :  { %v1642_v1 = vmul.f32 %v2695_v57, %v3039_v27  ;;  %v2697_v5 = vpop.eup %2696  ;;  %v1630_v6 = vadd.f32 %v3045_v33, %v1629_v55  ;;  %vm1647_vm9 = vweird.f32 %v2695_v57  ;;  %vm1603_vm12 = vmor %vm1601_vm4, %vm1602_vm7  ;;  %v1653_v27 = vor.u32 1.1754944e-38, %v1652_v8 }
 0x2a9   :  { %v1598_v3 = vsub.f32 1.0, %v1597_v59  ;;  %v3096_v9 = vpop.eup %2698  ;;  %v3098_v11 = vadd.f32 1.0, %v2697_v5  ;;  %v1619_v18 = vsel %vm3102_vm8, %v3042_v29, %v1615_v2  ;;  %vm1648_vm14 = vmor %vm1646_vm11, %vm1647_vm9  ;;  %v1486_v47 = vadd.f32 %v1485_v32, %v1088_v36  ;;  %v1515_v2 = vpop.f32.mrf.mxu1 }
 0x2aa   :  { %v1643_v7 = vsub.f32 1.0, %v1642_v1  ;;  %v1732_v16 = vmul.f32 %v3096_v9, %v3057_v43  ;;  %v1634_v23 = vsel %vm3114_vm10, %v3045_v33, %v1630_v6  ;;  %v1624_v29 = vsel %vm3072_vm2, %v1623_v54, %v1619_v18  ;;  %v1527_v33 = vpop.f32.mrf.mxu2  ;;  %v1487_v32 = vpop.f32.mrf.mxu3 }
 0x2ab   :  { %v1599_v10 = vmul.f32 %v2693_v53, %v1598_v3  ;;  %2702 = vrcp.f32 %v3098_v11  ;;  %v3120_v22 = vpop.eup %2700  ;;  %v1639_v20 = vsel %vm3082_vm3, %v1638_v56, %v1634_v23  ;;  %v1528_v49 = vadd.f32 %v1527_v33, %v1091_v52 }
 0x2ac   :  { %v1644_v14 = vmul.f32 %v2695_v57, %v1643_v7  ;;  %v1733_v25 = vsub.f32 1.0, %v1732_v16  ;;  %2704 = vpow2.f32 %v1570_v12  ;;  %v1747_v38 = vmul.f32 %v3120_v22, %v3064_v48 }
 0x2ad   :  { %v1600_v17 = vadd.f32 %v2693_v53, %v1599_v10  ;;  %vm1737_vm1 = vweird.f32 %v3096_v9  ;;  %v1742_v50 = vand.u32 2147483648, %v3057_v43  ;;  %v1502_v54 = vadd.f32 %v1501_v39, %v1089_v28 }
 0x2ae   :  { %v1645_v24 = vadd.f32 %v2695_v57, %v1644_v14  ;;  %v1734_v41 = vmul.f32 %v3096_v9, %v1733_v25  ;;  %v1748_v56 = vsub.f32 1.0, %v1747_v38  ;;  %2706 = vpow2.f32 %v1558_v42  ;;  %vm3164_vm3 = vmor %vm1736_vm0, %vm1737_vm1 }
 0x2af   :  { %v1604_v26 = vsel %vm1603_vm12, %v2693_v53, %v1600_v17  ;;  %v1536_v58 = vsub.f32 0.0, %v1486_v47  ;;  %v1539_v62 = vsub.f32 0.0, %v1528_v49  ;;  %v1725_v63 = vand.u32 2147483647, %v3098_v11 }
 0x2b0   :  { %v1609_v30 = vsel %vm1606_vm13, %v1608_v21, %v1604_v26  ;;  %v1649_v31 = vsel %vm1648_vm14, %v2695_v57, %v1645_v24  ;;  %v1560_v57 = vmul.f32 1.442695, %v1538_v46  ;;  %v1735_v59 = vadd.f32 %v3096_v9, %v1734_v41 }
 0x2b1   :  { %v1836_v34 = vpack.c.bf16 %v1624_v29, %v1609_v30  ;;  %v1654_v37 = vsel %vm1651_vm15, %v1653_v27, %v1649_v31  ;;  %v2703_v44 = vpop.eup %2702  ;;  %v1727_v0 = vand.u32 2147483648, %v3098_v11  ;;  %v1556_v1 = vmul.f32 1.442695, %v1536_v58 }
 0x2b2   :  { %v1837_v40 = vpack.c.bf16 %v1654_v37, %v1639_v20  ;;  %v1717_v53 = vmul.f32 %v2703_v44, %v3098_v11  ;;  %v2705_v55 = vpop.eup %2704  ;;  %2708 = vpow2.f32 %v1560_v57  ;;  %vm1722_vm2 = vweird.f32 %v2703_v44 }
 0x2b3   :  { %1844 = vst [vmem:[%s3360_s12] sm:$0xff] %v1836_v34  ;;  %v3155_v61 = vadd.f32 1.0, %v2705_v55  ;;  %v1545_v28 = vsub.f32 0.0, %v1502_v54  ;;  %vm3168_vm4 = vcmp.eq.f32.partialorder %v1740_v45, 8.507059e+37  ;;  %vm1721_vm5 = vweird.f32 %v3098_v11 }
 0x2b4   :  { %1845 = vst [vmem:[%s3360_s12 + $0x8] sm:$0xff] %v1837_v40  ;;  %v1718_v60 = vsub.f32 1.0, %v1717_v53  ;;  %v1562_v6 = vmul.f32 1.442695, %v1539_v62  ;;  %v1739_v7 = vsel %vm3164_vm3, %v3096_v9, %v1735_v59  ;;  %v1749_v8 = vmul.f32 %v3120_v22, %v1748_v56  ;;  %v2707_v12 = vpop.eup %2706  ;;  %vm1723_vm6 = vmor %vm1721_vm5, %vm1722_vm2 }
 0x2b5   :  { %2710 = vrcp.f32 %v3155_v61  ;;  %v1516_v43 = vadd.f32 %v1515_v2, %v1090_v35  ;;  %v1743_v13 = vor.u32 1.1754944e-38, %v1742_v50  ;;  %vm1726_vm7 = vcmp.eq.f32.partialorder %v1725_v63, 8.507059e+37 }
 0x2b6   :  { %v1719_v3 = vmul.f32 %v2703_v44, %v1718_v60  ;;  %2712 = vpow2.f32 %v1556_v1  ;;  %v1728_v14 = vor.u32 1.1754944e-38, %v1727_v0  ;;  %v3179_v11 = vadd.f32 1.0, %v2707_v12 }
 0x2b7   :  { %2714 = vpow2.f32 %v1562_v6  ;;  %v1574_v16 = vmul.f32 1.442695, %v1545_v28  ;;  %v1546_v18 = vsub.f32 0.0, %v1516_v43  ;;  %v1744_v9 = vsel %vm3168_vm4, %v1743_v13, %v1739_v7 }
 0x2b8   :  { %v1720_v10 = vadd.f32 %v2703_v44, %v1719_v3  ;;  %v2709_v19 = vpop.eup %2708  ;;  %v1755_v17 = vand.u32 2147483647, %v3064_v48  ;;  %v1750_v35 = vadd.f32 %v3120_v22, %v1749_v8  ;;  %vm1752_vm8 = vweird.f32 %v3120_v22 }
 0x2b9   :  { %2716 = vrcp.f32 %v3179_v11  ;;  %vm1751_vm9 = vweird.f32 %v3064_v48  ;;  %v3189_v27 = vadd.f32 1.0, %v2709_v19  ;;  %v1757_v29 = vand.u32 2147483648, %v3064_v48  ;;  %v1529_v48 = vpop.f32.mrf.mxu2 }
 0x2ba   :  { %v1724_v15 = vsel %vm1723_vm6, %v2703_v44, %v1720_v10  ;;  %2718 = vpow2.f32 %v1574_v16  ;;  %v1576_v31 = vmul.f32 1.442695, %v1546_v18  ;;  %vm3197_vm10 = vmor %vm1751_vm9, %vm1752_vm8  ;;  %vm3201_vm11 = vcmp.eq.f32.partialorder %v1755_v17, 8.507059e+37 }
 0x2bb   :  { %v1729_v23 = vsel %vm1726_vm7, %v1728_v14, %v1724_v15  ;;  %v2711_v21 = vpop.eup %2710  ;;  %2720 = vrcp.f32 %v3189_v27  ;;  %v1754_v38 = vsel %vm3197_vm10, %v3120_v22, %v1750_v35  ;;  %v1770_v39 = vand.u32 2147483647, %v3155_v61 }
 0x2bc   :  { %v1840_v24 = vpack.c.bf16 %v1744_v9, %v1729_v23  ;;  %v2713_v25 = vpop.eup %2712  ;;  %v1762_v26 = vmul.f32 %v2711_v21, %v3155_v61  ;;  %v1772_v40 = vand.u32 2147483648, %v3155_v61  ;;  %vm1767_vm12 = vweird.f32 %v2711_v21 }
 0x2bd   :  { %v3195_v30 = vadd.f32 1.0, %v2713_v25  ;;  %v2715_v33 = vpop.eup %2714  ;;  %v1488_v44 = vadd.f32 %v1487_v32, %v1088_v36  ;;  %v1758_v46 = vor.u32 1.1754944e-38, %v1757_v29  ;;  %vm1766_vm13 = vweird.f32 %v3155_v61 }
 0x2be   :  { %1848 = vst [vmem:[%s3360_s12 + $0x20] sm:$0xff] %v1840_v24  ;;  %v1763_v37 = vsub.f32 1.0, %v1762_v26  ;;  %v3212_v42 = vadd.f32 1.0, %v2715_v33  ;;  %v1530_v22 = vadd.f32 %v1529_v48, %v1091_v52  ;;  %v1680_v50 = vand.u32 2147483647, %v3179_v11  ;;  %vm1768_vm14 = vmor %vm1766_vm13, %vm1767_vm12 }
 0x2bf   :  { %2722 = vrcp.f32 %v3195_v30  ;;  %v3216_v45 = vpop.eup %2716  ;;  %v1682_v53 = vand.u32 2147483648, %v3179_v11  ;;  %v1759_v36 = vsel %vm3201_vm11, %v1758_v46, %v1754_v38  ;;  %v1773_v55 = vor.u32 1.1754944e-38, %v1772_v40 }
 0x2c0   :  { %v1764_v41 = vmul.f32 %v2711_v21, %v1763_v37  ;;  %2724 = vpow2.f32 %v1576_v31  ;;  %v1672_v49 = vmul.f32 %v3216_v45, %v3179_v11  ;;  %v2719_v54 = vpop.eup %2718  ;;  %vm1771_vm15 = vcmp.eq.f32.partialorder %v1770_v39, 8.507059e+37 }
 0x2c1   :  { %2726 = vrcp.f32 %v3212_v42  ;;  %v3228_v56 = vpop.eup %2720  ;;  %v1544_v57 = vsub.f32 0.0, %v1488_v44  ;;  %vm1676_vm0 = vweird.f32 %v3179_v11  ;;  %v1547_v61 = vsub.f32 0.0, %v1530_v22 }
 0x2c2   :  { %v1765_v47 = vadd.f32 %v2711_v21, %v1764_v41  ;;  %v1673_v52 = vsub.f32 1.0, %v1672_v49  ;;  %v1687_v60 = vmul.f32 %v3228_v56, %v3189_v27  ;;  %vm3234_vm1 = vcmp.eq.f32.partialorder %v1680_v50, 8.507059e+37 }
 0x2c3   :  { %v1683_v1 = vor.u32 1.1754944e-38, %v1682_v53  ;;  %vm1691_vm2 = vweird.f32 %v3189_v27  ;;  %v1695_v4 = vand.u32 2147483647, %v3189_v27  ;;  %v3241_v5 = vadd.f32 1.0, %v2719_v54 }
 0x2c4   :  { %v1769_v51 = vsel %vm1768_vm14, %v2711_v21, %v1765_v47  ;;  %v1674_v63 = vmul.f32 %v3216_v45, %v1673_v52  ;;  %v1688_v28 = vsub.f32 1.0, %v1687_v60  ;;  %vm1677_vm3 = vweird.f32 %v3216_v45 }
 0x2c5   :  { %v2723_v58 = vpop.eup %2722  ;;  %v1774_v59 = vsel %vm1771_vm15, %v1773_v55, %v1769_v51  ;;  %v1697_v7 = vand.u32 2147483648, %v3189_v27  ;;  %v1665_v12 = vand.u32 2147483647, %v3195_v30  ;;  %v1667_v13 = vand.u32 2147483648, %v3195_v30  ;;  %vm3258_vm6 = vmor %vm1676_vm0, %vm1677_vm3 }
 0x2c6   :  { %v1841_v62 = vpack.c.bf16 %v1774_v59, %v1759_v36  ;;  %v1657_v2 = vmul.f32 %v2723_v58, %v3195_v30  ;;  %v2725_v3 = vpop.eup %2724  ;;  %v1675_v6 = vadd.f32 %v3216_v45, %v1674_v63  ;;  %v1689_v43 = vmul.f32 %v3228_v56, %v1688_v28 }
 0x2c7   :  { %v2727_v10 = vpop.eup %2726  ;;  %v3252_v14 = vadd.f32 1.0, %v2725_v3  ;;  %vm1661_vm4 = vweird.f32 %v3195_v30  ;;  %vm1662_vm5 = vweird.f32 %v2723_v58  ;;  %vm1692_vm7 = vweird.f32 %v3228_v56 }
 0x2c8   :  { %1849 = vst [vmem:[%s3360_s12 + $0x28] sm:$0xff] %v1841_v62  ;;  %v1658_v8 = vsub.f32 1.0, %v1657_v2  ;;  %v1702_v16 = vmul.f32 %v2727_v10, %v3212_v42  ;;  %2728 = vrcp.f32 %v3241_v5  ;;  %v1572_v19 = vmul.f32 1.442695, %v1544_v57  ;;  %vm1663_vm8 = vmor %vm1661_vm4, %vm1662_vm5 }
 0x2c9   :  { %v1578_v9 = vmul.f32 1.442695, %v1547_v61  ;;  %v1679_v17 = vsel %vm3258_vm6, %v3216_v45, %v1675_v6  ;;  %v1690_v23 = vadd.f32 %v3228_v56, %v1689_v43  ;;  %vm1666_vm9 = vcmp.eq.f32.partialorder %v1665_v12, 8.507059e+37  ;;  %vm3277_vm11 = vmor %vm1691_vm2, %vm1692_vm7 }
 0x2ca   :  { %v1659_v15 = vmul.f32 %v2723_v58, %v1658_v8  ;;  %v1703_v35 = vsub.f32 1.0, %v1702_v16  ;;  %v1668_v11 = vor.u32 1.1754944e-38, %v1667_v13  ;;  %v1712_v24 = vand.u32 2147483648, %v3212_v42 }
 0x2cb   :  { %2730 = vrcp.f32 %v3252_v14  ;;  %vm1707_vm10 = vweird.f32 %v2727_v10  ;;  %v1710_v29 = vand.u32 2147483647, %v3212_v42  ;;  %v1684_v30 = vsel %vm3234_vm1, %v1683_v1, %v1679_v17 }
 0x2cc   :  { %v1660_v21 = vadd.f32 %v2723_v58, %v1659_v15  ;;  %v1704_v26 = vmul.f32 %v2727_v10, %v1703_v35  ;;  %vm1706_vm12 = vweird.f32 %v3212_v42  ;;  %2732 = vpow2.f32 %v1572_v19 }
 0x2cd   :  { %v1694_v33 = vsel %vm3277_vm11, %v3228_v56, %v1690_v23  ;;  %2734 = vpow2.f32 %v1578_v9  ;;  %v1698_v48 = vor.u32 1.1754944e-38, %v1697_v7  ;;  %vm1708_vm13 = vmor %vm1706_vm12, %vm1707_vm10  ;;  %v1713_v27 = vor.u32 1.1754944e-38, %v1712_v24 }
 0x2ce   :  { %v1664_v25 = vsel %vm1663_vm8, %v2723_v58, %v1660_v21  ;;  %v1705_v34 = vadd.f32 %v2727_v10, %v1704_v26  ;;  %v3285_v37 = vpop.eup %2728  ;;  %vm1696_vm14 = vcmp.eq.f32.partialorder %v1695_v4, 8.507059e+37  ;;  %vm1711_vm15 = vcmp.eq.f32.partialorder %v1710_v29, 8.507059e+37 }
 0x2cf   :  { %v1669_v32 = vsel %vm1666_vm9, %v1668_v11, %v1664_v25  ;;  %v1699_v40 = vsel %vm1696_vm14, %v1698_v48, %v1694_v33  ;;  %v1792_v45 = vmul.f32 %v3285_v37, %v3241_v5  ;;  %v1800_v54 = vand.u32 2147483647, %v3241_v5 }
 0x2d0   :  { %v1838_v20 = vpack.c.bf16 %v1684_v30, %v1669_v32  ;;  %v1709_v38 = vsel %vm1708_vm13, %v2727_v10, %v1705_v34  ;;  %v1802_v36 = vand.u32 2147483648, %v3241_v5  ;;  %vm1796_vm0 = vweird.f32 %v3241_v5 }
 0x2d1   :  { %v3290_v39 = vpop.eup %2730  ;;  %v1714_v41 = vsel %vm1711_vm15, %v1713_v27, %v1709_v38  ;;  %v1793_v50 = vsub.f32 1.0, %v1792_v45  ;;  %vm1797_vm1 = vweird.f32 %v3285_v37  ;;  %vm3305_vm2 = vcmp.eq.f32.partialorder %v1800_v54, 8.507059e+37 }
 0x2d2   :  { %1846 = vst [vmem:[%s3360_s12 + $0x10] sm:$0xff] %v1838_v20  ;;  %v1839_v42 = vpack.c.bf16 %v1714_v41, %v1699_v40  ;;  %v2733_v44 = vpop.eup %2732  ;;  %v1807_v22 = vmul.f32 %v3290_v39, %v3252_v14  ;;  %v1803_v59 = vor.u32 1.1754944e-38, %v1802_v36  ;;  %v1815_v62 = vand.u32 2147483647, %v3252_v14  ;;  %vm3318_vm5 = vmor %vm1796_vm0, %vm1797_vm1 }
 0x2d3   :  { %v2735_v46 = vpop.eup %2734  ;;  %v1592_v47 = vadd.f32 1.0, %v2733_v44  ;;  %v1794_v55 = vmul.f32 %v3285_v37, %v1793_v50  ;;  %v1817_v63 = vand.u32 2147483648, %v3252_v14  ;;  %vm1812_vm3 = vweird.f32 %v3290_v39 }
 0x2d4   :  { %1847 = vst [vmem:[%s3360_s12 + $0x18] sm:$0xff] %v1839_v42  ;;  %v1595_v49 = vadd.f32 1.0, %v2735_v46  ;;  %v1808_v53 = vsub.f32 1.0, %v1807_v22  ;;  %vm1811_vm6 = vweird.f32 %v3252_v14  ;;  %vm3330_vm9 = vcmp.eq.f32.partialorder %v1815_v62, 8.507059e+37 }
 0x2d5   :  { %2736 = vrcp.f32 %v1592_v47  ;;  %v1795_v61 = vadd.f32 %v3285_v37, %v1794_v55  ;;  %v1787_v2 = vand.u32 2147483648, %v1592_v47  ;;  %v1785_v4 = vand.u32 2147483647, %v1592_v47  ;;  %vm3326_vm8 = vmor %vm1811_vm6, %vm1812_vm3 }
 0x2d6   :  { %2738 = vrcp.f32 %v1595_v49  ;;  %v1809_v51 = vmul.f32 %v3290_v39, %v1808_v53  ;;  %v1832_v6 = vand.u32 2147483648, %v1595_v49  ;;  %v1830_v10 = vand.u32 2147483647, %v1595_v49 }
 0x2d7   :  { %v1799_v43 = vsel %vm3318_vm5, %v3285_v37, %v1795_v61  ;;  %vm1781_vm10 = vweird.f32 %v1592_v47  ;;  %v1788_v15 = vor.u32 1.1754944e-38, %v1787_v2  ;;  %vm1826_vm12 = vweird.f32 %v1595_v49 }
 0x2d8   :  { %v1810_v1 = vadd.f32 %v3290_v39, %v1809_v51  ;;  %v1818_v18 = vor.u32 1.1754944e-38, %v1817_v63  ;;  %vm1786_vm13 = vcmp.eq.f32.partialorder %v1785_v4, 8.507059e+37  ;;  %v1833_v9 = vor.u32 1.1754944e-38, %v1832_v6 }
 0x2d9   :  { %v1804_v17 = vsel %vm3305_vm2, %v1803_v59, %v1799_v43  ;;  %vm1831_vm15 = vcmp.eq.f32.partialorder %v1830_v10, 8.507059e+37 }
 0x2da   :  { %v1814_v14 = vsel %vm3326_vm8, %v3290_v39, %v1810_v1 }
 0x2db   :  { %v2737_v56 = vpop.eup %2736  ;;  %v1819_v35 = vsel %vm3330_vm9, %v1818_v18, %v1814_v14 }
 0x2dc   :  { %v2739_v52 = vpop.eup %2738  ;;  %v1777_v57 = vmul.f32 %v2737_v56, %v1592_v47  ;;  %vm1782_vm4 = vweird.f32 %v2737_v56 }
 0x2dd   :  { %v1822_v60 = vmul.f32 %v2739_v52, %v1595_v49  ;;  %vm1827_vm7 = vweird.f32 %v2739_v52  ;;  %vm1783_vm11 = vmor %vm1781_vm10, %vm1782_vm4 }
 0x2de   :  { %v1778_v0 = vsub.f32 1.0, %v1777_v57  ;;  %vm1828_vm14 = vmor %vm1826_vm12, %vm1827_vm7 }
 0x2df   :  { %v1823_v3 = vsub.f32 1.0, %v1822_v60 }
 0x2e0   :  { %v1779_v28 = vmul.f32 %v2737_v56, %v1778_v0 }
 0x2e1   :  { %v1824_v8 = vmul.f32 %v2739_v52, %v1823_v3 }
 0x2e2   :  { %v1780_v5 = vadd.f32 %v2737_v56, %v1779_v28 }
 0x2e3   :  { %v1825_v16 = vadd.f32 %v2739_v52, %v1824_v8 }
 0x2e4   :  { %v1784_v19 = vsel %vm1783_vm11, %v2737_v56, %v1780_v5 }
 0x2e5   :  { %v1789_v23 = vsel %vm1786_vm13, %v1788_v15, %v1784_v19  ;;  %v1829_v21 = vsel %vm1828_vm14, %v2739_v52, %v1825_v16 }
 0x2e6   :  { %v1842_v11 = vpack.c.bf16 %v1804_v17, %v1789_v23  ;;  %v1834_v24 = vsel %vm1831_vm15, %v1833_v9, %v1829_v21 }
 0x2e7   :  { %v1843_v25 = vpack.c.bf16 %v1834_v24, %v1819_v35 }
 0x2e8   :  { %1850 = vst [vmem:[%s3360_s12 + $0x30] sm:$0xff] %v1842_v11 }
 0x2e9   :  { %1851 = vst [vmem:[%s3360_s12 + $0x38] sm:$0xff] %v1843_v25 }
 0x2ea   :  { %1860 = vsyncpa [#allocation3], 1 }
 0x2eb   :  { %1861 = vsyncpa [#allocation5], 1 }

</bundles_post_ra>
